<compile_context>
chip_gen: v6e
topology: v6e:2x2x1
jax: 0.10.0
libtpu: 0.0.40
codegen_flags: <defaults>
</compile_context>

<pallas_src>
import functools

import jax
import jax.numpy as jnp
from jax.experimental import pallas as pl
from jax.experimental.pallas import tpu as pltpu


def conv_bn_relu_kernel(x_ref, w_ref, bias_ref, o_ref, *, width):
    """One (image, Cout-tile) pair per grid step.

    x_ref:    (1, H*W, Cin)     bf16  flattened NHWC image
    w_ref:    (9, Cin, TCOUT)   bf16  BN-scale-folded conv taps, tap k = kh*3 + kw
    bias_ref: (1, TCOUT)        f32   folded BN bias (beta - mean*scale)
    o_ref:    (1, H*W, TCOUT)   f32   flattened NHWC output tile
    """
    hw, cin = x_ref.shape[1], x_ref.shape[2]
    tcout = o_ref.shape[2]
    W = width
    n_rows = hw + 2 * W

    # Build the H-halo by stacking zero image-rows along the leading (flattened-row)
    # axis -- cheap vreg stacking, no HBM padding. Shift construction is done in f32
    # (32-bit sublane ops are the well-supported path); values are already
    # bf16-quantized so no extra rounding is introduced.
    x = x_ref[0].astype(jnp.float32)                          # (H*W, Cin)
    zrow = jnp.zeros((W, cin), jnp.float32)
    xc = jnp.concatenate([zrow, x, zrow], axis=0)             # ((H+2)*W, Cin)

    # W-direction +/-1 shifts via XLU sublane rotation + zero-masking of the
    # wrapped boundary column (the conv's zero padding in W).
    wpos = jax.lax.broadcasted_iota(jnp.int32, (n_rows, cin), 0) % W
    zero = jnp.zeros_like(xc)
    xl = jnp.where(wpos == 0, zero, pltpu.roll(xc, 1, axis=0))               # x[h, w-1]
    xr = jnp.where(wpos == W - 1, zero, pltpu.roll(xc, n_rows - 1, axis=0))  # x[h, w+1]

    # bf16 operands for the MXU; accumulate in f32 directly into the output block.
    taps = tuple(v.astype(jnp.bfloat16) for v in (xl, xc, xr))  # kw = 0, 1, 2
    o_ref[0] = jnp.zeros((hw, tcout), jnp.float32)
    for kh in range(3):
        for kw in range(3):
            piece = taps[kw][kh * W: kh * W + hw]             # (H*W, Cin) aligned row slice
            o_ref[0] += jnp.dot(piece, w_ref[kh * 3 + kw],
                                preferred_element_type=jnp.float32)

    # Folded-BN bias + ReLU epilogue (BN scale already folded into the weights).
    o_ref[0] = jnp.maximum(o_ref[0] + bias_ref[...], 0.0)


def conv_bn_relu(x_nchw, weight_oihw, gamma, beta, running_mean, running_var,
                 eps=1e-5):
    """PyTorch-semantics ConvBNReLU forward (ks=3, stride=1, padding=1, bias=False).

    x_nchw:      (N, Cin, H, W)
    weight_oihw: (Cout, Cin, 3, 3)
    Returns (N, Cout, H, W) float32.
    """
    # TODO(synk): BatchNorm is eval-mode only (running stats folded into scale/bias);
    # training-mode batch-statistic computation / running-stat update is not implemented.
    N, Cin, H, W = x_nchw.shape
    Cout = weight_oihw.shape[0]
    HW = H * W

    # Fold eval-mode BN into a per-channel scale (into the weights) and bias.
    scale = gamma.astype(jnp.float32) / jnp.sqrt(running_var.astype(jnp.float32) + eps)
    bias = beta.astype(jnp.float32) - running_mean.astype(jnp.float32) * scale

    # NCHW -> flattened NHWC in bf16 (cast fuses with the transpose copy; halves HBM reads).
    x_flat = jnp.transpose(x_nchw, (0, 2, 3, 1)).astype(jnp.bfloat16).reshape(N, HW, Cin)

    # (Cout, Cin, kh, kw) -> (kh, kw, Cin, Cout), BN scale folded in, Cout padded to a
    # multiple of 128 so output stores are lane-dense.
    TCOUT = 128
    cout_pad = ((Cout + TCOUT - 1) // TCOUT) * TCOUT
    w_hwio = jnp.transpose(weight_oihw, (2, 3, 1, 0)).astype(jnp.float32)
    w_hwio = w_hwio * scale[None, None, None, :]
    w_taps = jnp.pad(w_hwio, ((0, 0), (0, 0), (0, 0), (0, cout_pad - Cout)))
    w_taps = w_taps.reshape(9, Cin, cout_pad).astype(jnp.bfloat16)
    bias_pad = jnp.pad(bias, (0, cout_pad - Cout)).reshape(1, cout_pad)

    kernel = functools.partial(conv_bn_relu_kernel, width=W)
    out_flat = pl.pallas_call(
        kernel,
        out_shape=jax.ShapeDtypeStruct((N, HW, cout_pad), jnp.float32),
        grid_spec=pltpu.PrefetchScalarGridSpec(
            num_scalar_prefetch=0,
            grid=(N, cout_pad // TCOUT),
            in_specs=[
                pl.BlockSpec((1, HW, Cin), lambda n, j: (n, 0, 0)),
                pl.BlockSpec((9, Cin, TCOUT), lambda n, j: (0, 0, j)),
                pl.BlockSpec((1, TCOUT), lambda n, j: (0, j)),
            ],
            out_specs=pl.BlockSpec((1, HW, TCOUT), lambda n, j: (n, 0, j)),
        ),
        compiler_params=pltpu.CompilerParams(
            dimension_semantics=("parallel", "parallel"),
            # Headroom for big spatial tiles (v5e scoped default is only 16 MiB).
            vmem_limit_bytes=32 * 1024 * 1024,
        ),
    )(x_flat, w_taps, bias_pad)

    # Un-flatten, drop the padded channels, return NCHW (fuses into one copy).
    out_nhwc = out_flat.reshape(N, H, W, cout_pad)
    return jnp.transpose(out_nhwc[..., :Cout], (0, 3, 1, 2))


def _reference(x_nchw, weight_oihw, gamma, beta, running_mean, running_var,
               eps=1e-5):
    y = jax.lax.conv_general_dilated(
        x_nchw.astype(jnp.float32), weight_oihw.astype(jnp.float32),
        window_strides=(1, 1), padding=((1, 1), (1, 1)),
        dimension_numbers=("NCHW", "OIHW", "NCHW"))
    scale = gamma / jnp.sqrt(running_var + eps)
    bias = beta - running_mean * scale
    y = y * scale[None, :, None, None] + bias[None, :, None, None]
    return jnp.maximum(y, 0.0)


if __name__ == "__main__":
    key = jax.random.PRNGKey(0)
    kx, kw, kg, kb, km, kv = jax.random.split(key, 6)

    N, Cin, Cout, H, W = 2, 4, 8, 16, 16
    x = jax.random.normal(kx, (N, Cin, H, W), dtype=jnp.float32)
    weight = jax.random.normal(kw, (Cout, Cin, 3, 3), dtype=jnp.float32) * 0.1
    gamma = 1.0 + 0.1 * jax.random.normal(kg, (Cout,), dtype=jnp.float32)
    beta = 0.1 * jax.random.normal(kb, (Cout,), dtype=jnp.float32)
    running_mean = 0.1 * jax.random.normal(km, (Cout,), dtype=jnp.float32)
    running_var = jnp.abs(jax.random.normal(kv, (Cout,), dtype=jnp.float32)) + 0.5

    out = conv_bn_relu(x, weight, gamma, beta, running_mean, running_var)
    out = jax.block_until_ready(out)

    ref = _reference(x, weight, gamma, beta, running_mean, running_var)
    assert out.shape == (N, Cout, H, W)
    # bf16 MXU operands -> looser tolerance than a pure-f32 conv.
    assert jnp.allclose(out, ref, atol=5e-2, rtol=5e-2), \
        f"max abs diff {jnp.max(jnp.abs(out - ref))}"

    print("KERNEL_OK")
</pallas_src>

<mosaic_0001>
module attributes {stable_mosaic.version = 11 : i64} {
  func.func @conv_bn_relu_kernel(%arg0: i32, %arg1: i32, %arg2: memref<1x256x4xbf16, #tpu.memory_space<vmem>>, %arg3: memref<9x4x128xbf16, #tpu.memory_space<vmem>>, %arg4: memref<1x128xf32, #tpu.memory_space<vmem>>, %arg5: memref<1x256x128xf32, #tpu.memory_space<vmem>>) attributes {dimension_semantics = [#tpu.dimension_semantics<parallel>, #tpu.dimension_semantics<parallel>], iteration_bounds = array<i64: 2, 1>, scalar_prefetch = 0 : i64, scratch_operands = 0 : i64, tpu.core_type = #tpu.core_type<tc>, window_params = [{transform_indices = @transform_0, window_bounds = array<i64: 1, 256, 4>}, {transform_indices = @transform_1, window_bounds = array<i64: 9, 4, 128>}, {transform_indices = @transform_2, window_bounds = array<i64: 1, 128>}, {transform_indices = @transform_3, window_bounds = array<i64: 1, 256, 128>}]} {
    %c0 = arith.constant 0 : index
    %c0_0 = arith.constant 0 : index
    %c0_1 = arith.constant 0 : index
    %0 = vector.load %arg2[%c0, %c0_0, %c0_1] : memref<1x256x4xbf16, #tpu.memory_space<vmem>>, vector<1x256x4xbf16>
    %1 = vector.shape_cast %0 : vector<1x256x4xbf16> to vector<256x4xbf16>
    %2 = arith.extf %1 : vector<256x4xbf16> to vector<256x4xf32>
    %cst = arith.constant 0.000000e+00 : f32
    %3 = vector.broadcast %cst : f32 to vector<16x4xf32>
    %4 = tpu.concatenate %3, %2, %3 in 0 : vector<16x4xf32>, vector<256x4xf32>, vector<16x4xf32> -> vector<288x4xf32>
    %5 = tpu.iota {dimensions = array<i32: 0>} : vector<288x4xi32>
    %c16_i32 = arith.constant 16 : i32
    %c0_i32 = arith.constant 0 : i32
    %6 = arith.cmpi eq, %c16_i32, %c0_i32 : i32
    %c1_i32 = arith.constant 1 : i32
    %7 = arith.select %6, %c1_i32, %c16_i32 : i32
    %8 = vector.broadcast %7 : i32 to vector<288x4xi32>
    %9 = arith.remsi %5, %8 : vector<288x4xi32>
    %c0_i32_2 = arith.constant 0 : i32
    %10 = vector.broadcast %c0_i32_2 : i32 to vector<288x4xi32>
    %11 = arith.cmpi ne, %9, %10 : vector<288x4xi32>
    %c0_i32_3 = arith.constant 0 : i32
    %12 = vector.broadcast %c0_i32_3 : i32 to vector<288x4xi32>
    %13 = arith.cmpi slt, %9, %12 : vector<288x4xi32>
    %c0_i32_4 = arith.constant 0 : i32
    %14 = arith.cmpi slt, %7, %c0_i32_4 : i32
    %15 = vector.broadcast %14 : i1 to vector<288x4xi1>
    %16 = vector.broadcast %15 : vector<288x4xi1> to vector<288x4xi1>
    %17 = arith.xori %13, %16 : vector<288x4xi1>
    %18 = arith.andi %17, %11 : vector<288x4xi1>
    %19 = vector.broadcast %7 : i32 to vector<288x4xi32>
    %20 = arith.addi %9, %19 : vector<288x4xi32>
    %21 = arith.select %18, %20, %9 : vector<288x4xi1>, vector<288x4xi32>
    %cst_5 = arith.constant 0.000000e+00 : f32
    %22 = vector.broadcast %cst_5 : f32 to vector<288x4xf32>
    %c0_i32_6 = arith.constant 0 : i32
    %23 = vector.broadcast %c0_i32_6 : i32 to vector<288x4xi32>
    %24 = arith.cmpi eq, %21, %23 : vector<288x4xi32>
    %c1_i32_7 = arith.constant 1 : i32
    %25 = tpu.dynamic_rotate %4 by %c1_i32_7 dim 0 : vector<288x4xf32>, i32 -> vector<288x4xf32>
    %26 = arith.select %24, %22, %25 : vector<288x4xi1>, vector<288x4xf32>
    %c15_i32 = arith.constant 15 : i32
    %27 = vector.broadcast %c15_i32 : i32 to vector<288x4xi32>
    %28 = arith.cmpi eq, %21, %27 : vector<288x4xi32>
    %c287_i32 = arith.constant 287 : i32
    %29 = tpu.dynamic_rotate %4 by %c287_i32 dim 0 : vector<288x4xf32>, i32 -> vector<288x4xf32>
    %30 = arith.select %28, %22, %29 : vector<288x4xi1>, vector<288x4xf32>
    %31 = arith.truncf %26 : vector<288x4xf32> to vector<288x4xbf16>
    %32 = arith.truncf %4 : vector<288x4xf32> to vector<288x4xbf16>
    %33 = arith.truncf %30 : vector<288x4xf32> to vector<288x4xbf16>
    %cst_8 = arith.constant 0.000000e+00 : f32
    %34 = vector.broadcast %cst_8 : f32 to vector<256x128xf32>
    %c0_9 = arith.constant 0 : index
    %c0_10 = arith.constant 0 : index
    %c0_11 = arith.constant 0 : index
    %35 = vector.load %arg5[%c0_9, %c0_10, %c0_11] : memref<1x256x128xf32, #tpu.memory_space<vmem>>, vector<1x256x128xf32>
    %36 = vector.shape_cast %35 : vector<1x256x128xf32> to vector<256x128xf32>
    %37 = vector.shape_cast %34 : vector<256x128xf32> to vector<1x256x128xf32>
    tpu.vector_store %arg5[%c0_9, %c0_10, %c0_11], %37 {strides = array<i32>} : memref<1x256x128xf32, #tpu.memory_space<vmem>>, vector<1x256x128xf32>,
    %38 = vector.extract_strided_slice %31 {offsets = [0, 0], sizes = [256, 4], strides = [1, 1]} : vector<288x4xbf16> to vector<256x4xbf16>
    %c0_12 = arith.constant 0 : index
    %c0_13 = arith.constant 0 : index
    %c0_14 = arith.constant 0 : index
    %39 = vector.load %arg5[%c0_12, %c0_13, %c0_14] : memref<1x256x128xf32, #tpu.memory_space<vmem>>, vector<1x256x128xf32>
    %40 = vector.shape_cast %39 : vector<1x256x128xf32> to vector<256x128xf32>
    %c0_15 = arith.constant 0 : index
    %c0_16 = arith.constant 0 : index
    %c0_17 = arith.constant 0 : index
    %41 = vector.load %arg3[%c0_15, %c0_16, %c0_17] : memref<9x4x128xbf16, #tpu.memory_space<vmem>>, vector<1x4x128xbf16>
    %42 = vector.shape_cast %41 : vector<1x4x128xbf16> to vector<4x128xbf16>
    %cst_18 = arith.constant dense<0.000000e+00> : vector<256x128xf32>
    %43 = tpu.matmul %38, %42, %cst_18 {dimension_numbers = #tpu.dot_dimension_numbers<[1], [0], [0], [1], [0, 0, 1, 1], [], []>} : vector<256x4xbf16>, vector<4x128xbf16>, vector<256x128xf32> -> vector<256x128xf32>
    %44 = arith.addf %40, %43 : vector<256x128xf32>
    %c0_19 = arith.constant 0 : index
    %c0_20 = arith.constant 0 : index
    %c0_21 = arith.constant 0 : index
    %45 = vector.load %arg5[%c0_19, %c0_20, %c0_21] : memref<1x256x128xf32, #tpu.memory_space<vmem>>, vector<1x256x128xf32>
    %46 = vector.shape_cast %45 : vector<1x256x128xf32> to vector<256x128xf32>
    %47 = vector.shape_cast %44 : vector<256x128xf32> to vector<1x256x128xf32>
    tpu.vector_store %arg5[%c0_19, %c0_20, %c0_21], %47 {strides = array<i32>} : memref<1x256x128xf32, #tpu.memory_space<vmem>>, vector<1x256x128xf32>,
    %48 = vector.extract_strided_slice %32 {offsets = [0, 0], sizes = [256, 4], strides = [1, 1]} : vector<288x4xbf16> to vector<256x4xbf16>
    %c0_22 = arith.constant 0 : index
    %c0_23 = arith.constant 0 : index
    %c0_24 = arith.constant 0 : index
    %49 = vector.load %arg5[%c0_22, %c0_23, %c0_24] : memref<1x256x128xf32, #tpu.memory_space<vmem>>, vector<1x256x128xf32>
    %50 = vector.shape_cast %49 : vector<1x256x128xf32> to vector<256x128xf32>
    %c1 = arith.constant 1 : index
    %c0_25 = arith.constant 0 : index
    %c0_26 = arith.constant 0 : index
    %51 = vector.load %arg3[%c1, %c0_25, %c0_26] : memref<9x4x128xbf16, #tpu.memory_space<vmem>>, vector<1x4x128xbf16>
    %52 = vector.shape_cast %51 : vector<1x4x128xbf16> to vector<4x128xbf16>
    %cst_27 = arith.constant dense<0.000000e+00> : vector<256x128xf32>
    %53 = tpu.matmul %48, %52, %cst_27 {dimension_numbers = #tpu.dot_dimension_numbers<[1], [0], [0], [1], [0, 0, 1, 1], [], []>} : vector<256x4xbf16>, vector<4x128xbf16>, vector<256x128xf32> -> vector<256x128xf32>
    %54 = arith.addf %50, %53 : vector<256x128xf32>
    %c0_28 = arith.constant 0 : index
    %c0_29 = arith.constant 0 : index
    %c0_30 = arith.constant 0 : index
    %55 = vector.load %arg5[%c0_28, %c0_29, %c0_30] : memref<1x256x128xf32, #tpu.memory_space<vmem>>, vector<1x256x128xf32>
    %56 = vector.shape_cast %55 : vector<1x256x128xf32> to vector<256x128xf32>
    %57 = vector.shape_cast %54 : vector<256x128xf32> to vector<1x256x128xf32>
    tpu.vector_store %arg5[%c0_28, %c0_29, %c0_30], %57 {strides = array<i32>} : memref<1x256x128xf32, #tpu.memory_space<vmem>>, vector<1x256x128xf32>,
    %58 = vector.extract_strided_slice %33 {offsets = [0, 0], sizes = [256, 4], strides = [1, 1]} : vector<288x4xbf16> to vector<256x4xbf16>
    %c0_31 = arith.constant 0 : index
    %c0_32 = arith.constant 0 : index
    %c0_33 = arith.constant 0 : index
    %59 = vector.load %arg5[%c0_31, %c0_32, %c0_33] : memref<1x256x128xf32, #tpu.memory_space<vmem>>, vector<1x256x128xf32>
    %60 = vector.shape_cast %59 : vector<1x256x128xf32> to vector<256x128xf32>
    %c2 = arith.constant 2 : index
    %c0_34 = arith.constant 0 : index
    %c0_35 = arith.constant 0 : index
    %61 = vector.load %arg3[%c2, %c0_34, %c0_35] : memref<9x4x128xbf16, #tpu.memory_space<vmem>>, vector<1x4x128xbf16>
    %62 = vector.shape_cast %61 : vector<1x4x128xbf16> to vector<4x128xbf16>
    %cst_36 = arith.constant dense<0.000000e+00> : vector<256x128xf32>
    %63 = tpu.matmul %58, %62, %cst_36 {dimension_numbers = #tpu.dot_dimension_numbers<[1], [0], [0], [1], [0, 0, 1, 1], [], []>} : vector<256x4xbf16>, vector<4x128xbf16>, vector<256x128xf32> -> vector<256x128xf32>
    %64 = arith.addf %60, %63 : vector<256x128xf32>
    %c0_37 = arith.constant 0 : index
    %c0_38 = arith.constant 0 : index
    %c0_39 = arith.constant 0 : index
    %65 = vector.load %arg5[%c0_37, %c0_38, %c0_39] : memref<1x256x128xf32, #tpu.memory_space<vmem>>, vector<1x256x128xf32>
    %66 = vector.shape_cast %65 : vector<1x256x128xf32> to vector<256x128xf32>
    %67 = vector.shape_cast %64 : vector<256x128xf32> to vector<1x256x128xf32>
    tpu.vector_store %arg5[%c0_37, %c0_38, %c0_39], %67 {strides = array<i32>} : memref<1x256x128xf32, #tpu.memory_space<vmem>>, vector<1x256x128xf32>,
    %68 = vector.extract_strided_slice %31 {offsets = [16, 0], sizes = [256, 4], strides = [1, 1]} : vector<288x4xbf16> to vector<256x4xbf16>
    %c0_40 = arith.constant 0 : index
    %c0_41 = arith.constant 0 : index
    %c0_42 = arith.constant 0 : index
    %69 = vector.load %arg5[%c0_40, %c0_41, %c0_42] : memref<1x256x128xf32, #tpu.memory_space<vmem>>, vector<1x256x128xf32>
    %70 = vector.shape_cast %69 : vector<1x256x128xf32> to vector<256x128xf32>
    %c3 = arith.constant 3 : index
    %c0_43 = arith.constant 0 : index
    %c0_44 = arith.constant 0 : index
    %71 = vector.load %arg3[%c3, %c0_43, %c0_44] : memref<9x4x128xbf16, #tpu.memory_space<vmem>>, vector<1x4x128xbf16>
    %72 = vector.shape_cast %71 : vector<1x4x128xbf16> to vector<4x128xbf16>
    %cst_45 = arith.constant dense<0.000000e+00> : vector<256x128xf32>
    %73 = tpu.matmul %68, %72, %cst_45 {dimension_numbers = #tpu.dot_dimension_numbers<[1], [0], [0], [1], [0, 0, 1, 1], [], []>} : vector<256x4xbf16>, vector<4x128xbf16>, vector<256x128xf32> -> vector<256x128xf32>
    %74 = arith.addf %70, %73 : vector<256x128xf32>
    %c0_46 = arith.constant 0 : index
    %c0_47 = arith.constant 0 : index
    %c0_48 = arith.constant 0 : index
    %75 = vector.load %arg5[%c0_46, %c0_47, %c0_48] : memref<1x256x128xf32, #tpu.memory_space<vmem>>, vector<1x256x128xf32>
    %76 = vector.shape_cast %75 : vector<1x256x128xf32> to vector<256x128xf32>
    %77 = vector.shape_cast %74 : vector<256x128xf32> to vector<1x256x128xf32>
    tpu.vector_store %arg5[%c0_46, %c0_47, %c0_48], %77 {strides = array<i32>} : memref<1x256x128xf32, #tpu.memory_space<vmem>>, vector<1x256x128xf32>,
    %78 = vector.extract_strided_slice %32 {offsets = [16, 0], sizes = [256, 4], strides = [1, 1]} : vector<288x4xbf16> to vector<256x4xbf16>
    %c0_49 = arith.constant 0 : index
    %c0_50 = arith.constant 0 : index
    %c0_51 = arith.constant 0 : index
    %79 = vector.load %arg5[%c0_49, %c0_50, %c0_51] : memref<1x256x128xf32, #tpu.memory_space<vmem>>, vector<1x256x128xf32>
    %80 = vector.shape_cast %79 : vector<1x256x128xf32> to vector<256x128xf32>
    %c4 = arith.constant 4 : index
    %c0_52 = arith.constant 0 : index
    %c0_53 = arith.constant 0 : index
    %81 = vector.load %arg3[%c4, %c0_52, %c0_53] : memref<9x4x128xbf16, #tpu.memory_space<vmem>>, vector<1x4x128xbf16>
    %82 = vector.shape_cast %81 : vector<1x4x128xbf16> to vector<4x128xbf16>
    %cst_54 = arith.constant dense<0.000000e+00> : vector<256x128xf32>
    %83 = tpu.matmul %78, %82, %cst_54 {dimension_numbers = #tpu.dot_dimension_numbers<[1], [0], [0], [1], [0, 0, 1, 1], [], []>} : vector<256x4xbf16>, vector<4x128xbf16>, vector<256x128xf32> -> vector<256x128xf32>
    %84 = arith.addf %80, %83 : vector<256x128xf32>
    %c0_55 = arith.constant 0 : index
    %c0_56 = arith.constant 0 : index
    %c0_57 = arith.constant 0 : index
    %85 = vector.load %arg5[%c0_55, %c0_56, %c0_57] : memref<1x256x128xf32, #tpu.memory_space<vmem>>, vector<1x256x128xf32>
    %86 = vector.shape_cast %85 : vector<1x256x128xf32> to vector<256x128xf32>
    %87 = vector.shape_cast %84 : vector<256x128xf32> to vector<1x256x128xf32>
    tpu.vector_store %arg5[%c0_55, %c0_56, %c0_57], %87 {strides = array<i32>} : memref<1x256x128xf32, #tpu.memory_space<vmem>>, vector<1x256x128xf32>,
    %88 = vector.extract_strided_slice %33 {offsets = [16, 0], sizes = [256, 4], strides = [1, 1]} : vector<288x4xbf16> to vector<256x4xbf16>
    %c0_58 = arith.constant 0 : index
    %c0_59 = arith.constant 0 : index
    %c0_60 = arith.constant 0 : index
    %89 = vector.load %arg5[%c0_58, %c0_59, %c0_60] : memref<1x256x128xf32, #tpu.memory_space<vmem>>, vector<1x256x128xf32>
    %90 = vector.shape_cast %89 : vector<1x256x128xf32> to vector<256x128xf32>
    %c5 = arith.constant 5 : index
    %c0_61 = arith.constant 0 : index
    %c0_62 = arith.constant 0 : index
    %91 = vector.load %arg3[%c5, %c0_61, %c0_62] : memref<9x4x128xbf16, #tpu.memory_space<vmem>>, vector<1x4x128xbf16>
    %92 = vector.shape_cast %91 : vector<1x4x128xbf16> to vector<4x128xbf16>
    %cst_63 = arith.constant dense<0.000000e+00> : vector<256x128xf32>
    %93 = tpu.matmul %88, %92, %cst_63 {dimension_numbers = #tpu.dot_dimension_numbers<[1], [0], [0], [1], [0, 0, 1, 1], [], []>} : vector<256x4xbf16>, vector<4x128xbf16>, vector<256x128xf32> -> vector<256x128xf32>
    %94 = arith.addf %90, %93 : vector<256x128xf32>
    %c0_64 = arith.constant 0 : index
    %c0_65 = arith.constant 0 : index
    %c0_66 = arith.constant 0 : index
    %95 = vector.load %arg5[%c0_64, %c0_65, %c0_66] : memref<1x256x128xf32, #tpu.memory_space<vmem>>, vector<1x256x128xf32>
    %96 = vector.shape_cast %95 : vector<1x256x128xf32> to vector<256x128xf32>
    %97 = vector.shape_cast %94 : vector<256x128xf32> to vector<1x256x128xf32>
    tpu.vector_store %arg5[%c0_64, %c0_65, %c0_66], %97 {strides = array<i32>} : memref<1x256x128xf32, #tpu.memory_space<vmem>>, vector<1x256x128xf32>,
    %98 = vector.extract_strided_slice %31 {offsets = [32, 0], sizes = [256, 4], strides = [1, 1]} : vector<288x4xbf16> to vector<256x4xbf16>
    %c0_67 = arith.constant 0 : index
    %c0_68 = arith.constant 0 : index
    %c0_69 = arith.constant 0 : index
    %99 = vector.load %arg5[%c0_67, %c0_68, %c0_69] : memref<1x256x128xf32, #tpu.memory_space<vmem>>, vector<1x256x128xf32>
    %100 = vector.shape_cast %99 : vector<1x256x128xf32> to vector<256x128xf32>
    %c6 = arith.constant 6 : index
    %c0_70 = arith.constant 0 : index
    %c0_71 = arith.constant 0 : index
    %101 = vector.load %arg3[%c6, %c0_70, %c0_71] : memref<9x4x128xbf16, #tpu.memory_space<vmem>>, vector<1x4x128xbf16>
    %102 = vector.shape_cast %101 : vector<1x4x128xbf16> to vector<4x128xbf16>
    %cst_72 = arith.constant dense<0.000000e+00> : vector<256x128xf32>
    %103 = tpu.matmul %98, %102, %cst_72 {dimension_numbers = #tpu.dot_dimension_numbers<[1], [0], [0], [1], [0, 0, 1, 1], [], []>} : vector<256x4xbf16>, vector<4x128xbf16>, vector<256x128xf32> -> vector<256x128xf32>
    %104 = arith.addf %100, %103 : vector<256x128xf32>
    %c0_73 = arith.constant 0 : index
    %c0_74 = arith.constant 0 : index
    %c0_75 = arith.constant 0 : index
    %105 = vector.load %arg5[%c0_73, %c0_74, %c0_75] : memref<1x256x128xf32, #tpu.memory_space<vmem>>, vector<1x256x128xf32>
    %106 = vector.shape_cast %105 : vector<1x256x128xf32> to vector<256x128xf32>
    %107 = vector.shape_cast %104 : vector<256x128xf32> to vector<1x256x128xf32>
    tpu.vector_store %arg5[%c0_73, %c0_74, %c0_75], %107 {strides = array<i32>} : memref<1x256x128xf32, #tpu.memory_space<vmem>>, vector<1x256x128xf32>,
    %108 = vector.extract_strided_slice %32 {offsets = [32, 0], sizes = [256, 4], strides = [1, 1]} : vector<288x4xbf16> to vector<256x4xbf16>
    %c0_76 = arith.constant 0 : index
    %c0_77 = arith.constant 0 : index
    %c0_78 = arith.constant 0 : index
    %109 = vector.load %arg5[%c0_76, %c0_77, %c0_78] : memref<1x256x128xf32, #tpu.memory_space<vmem>>, vector<1x256x128xf32>
    %110 = vector.shape_cast %109 : vector<1x256x128xf32> to vector<256x128xf32>
    %c7 = arith.constant 7 : index
    %c0_79 = arith.constant 0 : index
    %c0_80 = arith.constant 0 : index
    %111 = vector.load %arg3[%c7, %c0_79, %c0_80] : memref<9x4x128xbf16, #tpu.memory_space<vmem>>, vector<1x4x128xbf16>
    %112 = vector.shape_cast %111 : vector<1x4x128xbf16> to vector<4x128xbf16>
    %cst_81 = arith.constant dense<0.000000e+00> : vector<256x128xf32>
    %113 = tpu.matmul %108, %112, %cst_81 {dimension_numbers = #tpu.dot_dimension_numbers<[1], [0], [0], [1], [0, 0, 1, 1], [], []>} : vector<256x4xbf16>, vector<4x128xbf16>, vector<256x128xf32> -> vector<256x128xf32>
    %114 = arith.addf %110, %113 : vector<256x128xf32>
    %c0_82 = arith.constant 0 : index
    %c0_83 = arith.constant 0 : index
    %c0_84 = arith.constant 0 : index
    %115 = vector.load %arg5[%c0_82, %c0_83, %c0_84] : memref<1x256x128xf32, #tpu.memory_space<vmem>>, vector<1x256x128xf32>
    %116 = vector.shape_cast %115 : vector<1x256x128xf32> to vector<256x128xf32>
    %117 = vector.shape_cast %114 : vector<256x128xf32> to vector<1x256x128xf32>
    tpu.vector_store %arg5[%c0_82, %c0_83, %c0_84], %117 {strides = array<i32>} : memref<1x256x128xf32, #tpu.memory_space<vmem>>, vector<1x256x128xf32>,
    %118 = vector.extract_strided_slice %33 {offsets = [32, 0], sizes = [256, 4], strides = [1, 1]} : vector<288x4xbf16> to vector<256x4xbf16>
    %c0_85 = arith.constant 0 : index
    %c0_86 = arith.constant 0 : index
    %c0_87 = arith.constant 0 : index
    %119 = vector.load %arg5[%c0_85, %c0_86, %c0_87] : memref<1x256x128xf32, #tpu.memory_space<vmem>>, vector<1x256x128xf32>
    %120 = vector.shape_cast %119 : vector<1x256x128xf32> to vector<256x128xf32>
    %c8 = arith.constant 8 : index
    %c0_88 = arith.constant 0 : index
    %c0_89 = arith.constant 0 : index
    %121 = vector.load %arg3[%c8, %c0_88, %c0_89] : memref<9x4x128xbf16, #tpu.memory_space<vmem>>, vector<1x4x128xbf16>
    %122 = vector.shape_cast %121 : vector<1x4x128xbf16> to vector<4x128xbf16>
    %cst_90 = arith.constant dense<0.000000e+00> : vector<256x128xf32>
    %123 = tpu.matmul %118, %122, %cst_90 {dimension_numbers = #tpu.dot_dimension_numbers<[1], [0], [0], [1], [0, 0, 1, 1], [], []>} : vector<256x4xbf16>, vector<4x128xbf16>, vector<256x128xf32> -> vector<256x128xf32>
    %124 = arith.addf %120, %123 : vector<256x128xf32>
    %c0_91 = arith.constant 0 : index
    %c0_92 = arith.constant 0 : index
    %c0_93 = arith.constant 0 : index
    %125 = vector.load %arg5[%c0_91, %c0_92, %c0_93] : memref<1x256x128xf32, #tpu.memory_space<vmem>>, vector<1x256x128xf32>
    %126 = vector.shape_cast %125 : vector<1x256x128xf32> to vector<256x128xf32>
    %127 = vector.shape_cast %124 : vector<256x128xf32> to vector<1x256x128xf32>
    tpu.vector_store %arg5[%c0_91, %c0_92, %c0_93], %127 {strides = array<i32>} : memref<1x256x128xf32, #tpu.memory_space<vmem>>, vector<1x256x128xf32>,
    %c0_94 = arith.constant 0 : index
    %c0_95 = arith.constant 0 : index
    %c0_96 = arith.constant 0 : index
    %128 = vector.load %arg5[%c0_94, %c0_95, %c0_96] : memref<1x256x128xf32, #tpu.memory_space<vmem>>, vector<1x256x128xf32>
    %129 = vector.shape_cast %128 : vector<1x256x128xf32> to vector<256x128xf32>
    %c0_97 = arith.constant 0 : index
    %c0_98 = arith.constant 0 : index
    %130 = vector.load %arg4[%c0_97, %c0_98] : memref<1x128xf32, #tpu.memory_space<vmem>>, vector<1x128xf32>
    %131 = vector.broadcast %130 : vector<1x128xf32> to vector<256x128xf32>
    %132 = arith.addf %129, %131 : vector<256x128xf32>
    %cst_99 = arith.constant 0.000000e+00 : f32
    %133 = vector.broadcast %cst_99 : f32 to vector<256x128xf32>
    %134 = arith.maximumf %132, %133 : vector<256x128xf32>
    %c0_100 = arith.constant 0 : index
    %c0_101 = arith.constant 0 : index
    %c0_102 = arith.constant 0 : index
    %135 = vector.load %arg5[%c0_100, %c0_101, %c0_102] : memref<1x256x128xf32, #tpu.memory_space<vmem>>, vector<1x256x128xf32>
    %136 = vector.shape_cast %135 : vector<1x256x128xf32> to vector<256x128xf32>
    %137 = vector.shape_cast %134 : vector<256x128xf32> to vector<1x256x128xf32>
    tpu.vector_store %arg5[%c0_100, %c0_101, %c0_102], %137 {strides = array<i32>} : memref<1x256x128xf32, #tpu.memory_space<vmem>>, vector<1x256x128xf32>,
    return
  }
  func.func @transform_0(%arg0: i32, %arg1: i32) -> (i32, i32, i32) {
    %c0_i32 = arith.constant 0 : i32
    %c0_i32_0 = arith.constant 0 : i32
    %c0_i32_1 = arith.constant 0 : i32
    return %arg0, %c0_i32, %c0_i32_0 : i32, i32, i32
  }
  func.func @transform_1(%arg0: i32, %arg1: i32) -> (i32, i32, i32) {
    %c0_i32 = arith.constant 0 : i32
    %c0_i32_0 = arith.constant 0 : i32
    %c0_i32_1 = arith.constant 0 : i32
    return %c0_i32, %c0_i32_0, %arg1 : i32, i32, i32
  }
  func.func @transform_2(%arg0: i32, %arg1: i32) -> (i32, i32) {
    %c0_i32 = arith.constant 0 : i32
    %c0_i32_0 = arith.constant 0 : i32
    return %c0_i32, %arg1 : i32, i32
  }
  func.func @transform_3(%arg0: i32, %arg1: i32) -> (i32, i32, i32) {
    %c0_i32 = arith.constant 0 : i32
    %c0_i32_0 = arith.constant 0 : i32
    return %arg0, %c0_i32, %arg1 : i32, i32, i32
  }
}

</mosaic_0001>

<bundles_post_ra>
// kernel: tpu_custom_call.1
= control target key start
LH: loop header
LB: loop body
LE: loop exit
PB: predicated region body
PF: predicated region fallthrough
CT: control target
= control target key end

     0   :  { %8 = vsyncpa [#allocation3], 0  ;;  %s6236_s0 = inlined_call_operand.vmem [shape: bf16[2,256,4], index: 0, kind: input, shape index: {}]   ;;  %s6237_s1 = inlined_call_operand.vmem [shape: bf16[9,4,128], index: 1, kind: input, shape index: {}]   ;;  %s6238_s2 = inlined_call_operand.vmem [shape: f32[1,128], index: 2, kind: input, shape index: {}]   ;;  %s6239_s3 = inlined_call_operand.hbm [shape: f32[2,256,128], index: 3, kind: output, shape index: {}]  }
   0x1   :  { %10 = vsyncpa [#allocation3 + $0x1], 0  ;;  %s4723_s12 = smov 0   ;;  %s4725_s13 = smov 0  }
   0x2   :  { %s4727_s14 = smov 0   ;;  %s4729_s15 = smov 0  }
   0x3   :  { %s4731_s16 = smov 0   ;;  %s4733_s17 = smov 0  }
   0x4 LB: > { %s3876_s18 = sadd.s32 4294967295, %s4696_s17   ;;  %s3877_s19 = sadd.s32 4294967294, %s4696_s17   ;;  %s4696_s17 = sphi %s4733_s17, %s16_s17   ;;  %s4692_s16 = sphi %s4731_s16, %s6397_s16   ;;  %s4688_s15 = sphi %s4729_s15, %s6396_s15   ;;  %s4684_s14 = sphi %s4727_s14, %s6395_s14   ;;  %s4680_s13 = sphi %s4725_s13, %s6394_s13   ;;  %s4676_s12 = sphi %s4723_s12, %s6393_s12  }
   0x5   : > { %s28_s20 = sadd.s32 1, %s4692_s16  ;;  %s115_s21 = sadd.s32 1, %s4684_s14 }
   0x6   : > { %p30_p0 = scmp.ge.s32.totalorder %s28_s20, 2  ;;  %p125_p1 = scmp.ne.s32.totalorder %s4684_s14, %s4680_s13 }
   0x7   : > { %p126_p2 = scmp.eq.s32.totalorder %s3876_s18, 1  ;;  %p131_p3 = scmp.ne.s32.totalorder %s4680_s13, %s4676_s12 }
   0x8   : > { %s6399_s20 = smov (%p30_p0, %s28_s20), 0  ;;  %p132_p5 = scmp.eq.s32.totalorder %s3877_s19, 1 }
   0x9   : > { %p4763_p4 = por %p126_p2, %p125_p1  ;;  %s110_s23 = ssub.s32 %s4692_s16, %s6399_s20 }
   0xa   : > { %p3882_p6 = scmp.ge.s32.totalorder %s4696_s17, 1  ;;  %p113_p7 = scmp.eq.s32.totalorder %s110_s23, 0 }
   0xb   : > { %p4770_p8 = por %p132_p5, %p131_p3  ;;  %p171_p9 = scmp.lt.s32.totalorder %s4696_s17, 3 }
   0xc   : > { %s4776_s25 = scalar_select %p113_p7, %s4684_s14, %s115_s21  }
   0xd   : > { %p172_p10 = pnand %p3882_p6, %p171_p9 }
   0xf   : > { %175 = sbr.rel (%p172_p10) target bundleno = 546 (0x222), region = 32 }
  0x14   : > { %v1141_v0 = vld [vmem:[%s6237_s1] sm:$0x3]  ;;  %vm1191_vm0 = vcmask 1041408   ;;  %p202_p11 = scmp.lt.s32.totalorder %s4688_s15, 1  ;;  %v279_v1 = vlaneseq  ;;  %v3917_v3 = vld [vmem:[%s6237_s1 + $0x2] sm:$0x3] }
  0x15   : > { %4520 = vmatprep.subr.msk.bf16.mxu1 %vm1191_vm0, %v1141_v0  ;;  %v1193_v2 = vsel %vm1191_vm0, %v1141_v0, 0  ;;  %4519 = vmatprep.subr.msk.bf16.mxu0 %vm1191_vm0, %v1141_v0  ;;  %v3933_v4 = vld [vmem:[%s6237_s1 + $0x4] sm:$0x3]  ;;  %v6255_v6 = vmov 0.0|0.0   ;;  %vm1142_vm1 = vcmask 31744   ;;  %v1503_v9 = vsel %vm1191_vm0, %v3917_v3, 0 }
  0x16   : > { %4518 = vmatpush3.bf16.msra.mxu1 %v1193_v2  ;;  %s203_s5 = scalar_select %p202_p11, %s4688_s15, 1  ;;  %v4792_v5 = vshrl.u32 %v279_v1, 7  ;;  %4212 = vmatpush3.bf16.msra.mxu0 %v1193_v2  ;;  %v4812_v13 = vsel %vm1191_vm0, %v3933_v4, 0  ;;  %v4907_v60 = vld [vmem:[%s6237_s1 + $0x6] sm:$0x3] }
  0x17   : > { %4521 = vmatprep.subr.msk.bf16.mxu1 %vm1191_vm0, %v3917_v3  ;;  %4213 = vmatprep.mubr.bf16.mxu0 %v6255_v6  ;;  %v4919_v1 = vld [vmem:[%s6237_s1 + $0x8] sm:$0x3]  ;;  %s4057_s10 = sshll.u32 %s4688_s15, 12  ;;  %s4700_s26 = smov [#allocation2]  }
  0x18   : > { %s4056_s6 = sshll.u32 %s203_s5, 7  ;;  %v296_v7 = vadd.s32 128, %v4792_v5  ;;  %v298_v8 = vadd.s32 144, %v4792_v5  ;;  %v282_v10 = vadd.s32 16, %v4792_v5  ;;  %4522 = vmatprep.subr.msk.bf16.mxu0 %vm1191_vm0, %v3933_v4  ;;  %vm816_vm2 = vcmp.lt.s32.totalorder %v4792_v5, 1  ;;  %s199_s5 = sand.u32 1, %s4680_s13  }
  0x19   : > { %s4804_s9 = scalar_lea.vmem %s6236_s0, %s4056_s6  ;;  %v300_v11 = vadd.s32 160, %v4792_v5  ;;  %v4809_v12 = vadd.s32 176, %v4792_v5  ;;  %v284_v27 = vadd.s32 32, %v4792_v5  ;;  %v4834_v28 = vadd.s32 48, %v4792_v5  ;;  %s3883_s8 = sshll.u32 %s199_s5, 8 }
  0x1a   : > { %v4815_v14 = vld [vmem:[%s4804_s9 + $0x30] sm:$0xff]   ;;  %v4818_v15 = vld [vmem:[%s4804_s9 + $0x38] sm:$0xff]   ;;  %v432_v16 = vand.u32 15, %v296_v7  ;;  %v4821_v17 = vld [vmem:[%s4804_s9 + $0x40] sm:$0xff]   ;;  %v446_v18 = vand.u32 15, %v298_v8  ;;  %v334_v19 = vand.u32 15, %v282_v10  ;;  %s6183_s21 = scalar_lea.hbm %s6239_s3, %s4057_s10 }
  0x1b   : > { %v260_v20 = vunpack.c.h.bf16 %v4815_v14  ;;  %v261_v21 = vunpack.c.l.bf16 %v4818_v15  ;;  %v6254_v22 = vunpack.c.h.bf16 %v4818_v15  ;;  %v6253_v23 = vunpack.c.l.bf16 %v4821_v17  ;;  %v4828_v24 = vld [vmem:[%s4804_s9] sm:$0xff]   ;;  %v4869_v41 = vld [vmem:[%s4804_s9 + $0x48] sm:$0xff]   ;;  %v4878_v46 = vld [vmem:[%s4804_s9 + $0x50] sm:$0xff]   ;;  %s6191_s15 = scalar_lea.sflag [#allocation3], %s199_s5  ;;  %s4624_s27 = sshll.u32 %s4700_s26, 4  ;;  %s4625_s27 = int_to_ptr.vmem [resolvable:$false] %s4624_s27 }
  0x1c   : > { %v6252_v25 = vunpack.c.h.bf16 %v4821_v17  ;;  %v247_v26 = vunpack.c.l.bf16 %v4828_v24  ;;  %vm4836_vm3 = vcmp.eq.s32.totalorder %v432_v16, 0  ;;  %vm4848_vm4 = vcmp.eq.s32.totalorder %v446_v18, 0  ;;  %v4889_v51 = vld [vmem:[%s4804_s9 + $0x8] sm:$0xff]   ;;  %v4950_v29 = vld [vmem:[%s4804_s9 + $0x10] sm:$0xff]   ;;  %v4965_v33 = vld [vmem:[%s4804_s9 + $0x58] sm:$0xff]   ;;  %s4626_s28 = scalar_lea.vmem %s4625_s27, 8192 }
  0x1d   : > { %v4842_v30 = vrot.slane %v260_v20, 7  ;;  %v798_v31 = vrot.slane %v261_v21, 7  ;;  %v799_v32 = vrot.slane %v6254_v22, 7  ;;  %v800_v34 = vrot.slane %v6253_v23, 7 }
  0x1e   : > { %v801_v35 = vrot.slane %v6252_v25, 7  ;;  %v248_v36 = vunpack.c.h.bf16 %v4828_v24  ;;  %vm4862_vm5 = vcmp.eq.s32.totalorder %v334_v19, 0  ;;  %v784_v40 = vrot.slane %v247_v26, 7 }
  0x1f   : > { %v834_v37 = vsel %vm816_vm2, %v798_v31, %v799_v32  ;;  %v835_v38 = vsel %vm816_vm2, %v4842_v30, %v798_v31  ;;  %v833_v44 = vsel %vm816_vm2, %v799_v32, %v800_v34  ;;  %v6251_v55 = vunpack.c.l.bf16 %v4869_v41 }
  0x20   : > { %v866_v42 = vsel %vm4836_vm3, 0.0, %v835_v38  ;;  %v832_v43 = vsel %vm816_vm2, %v800_v34, %v801_v35  ;;  %v785_v45 = vrot.slane %v248_v36, 7  ;;  %v868_v48 = vsel %vm4848_vm4, 0.0, %v833_v44 }
  0x21   : > { %v4880_v47 = vpack.c.bf16 %v834_v37, %v866_v42  ;;  %v849_v49 = vsel %vm816_vm2, 0.0, %v784_v40  ;;  %v4886_v50 = vrot.slane %v248_v36, 1  ;;  %v4891_v52 = vpack.c.bf16 %v832_v43, %v868_v48  ;;  %v4983_v43 = vld [vmem:[%s4804_s9 + $0x60] sm:$0xff]  }
  0x22   : > { %v848_v53 = vsel %vm816_vm2, %v784_v40, %v785_v45  ;;  %v852_v54 = vsel %vm4862_vm5, 0.0, %v849_v49  ;;  %v6249_v57 = vunpack.c.h.bf16 %v4869_v41  ;;  %v460_v58 = vand.u32 15, %v300_v11 }
  0x23   : > { %4229 = vmatprep.mubr.msk.bf16.mxu1 %vm1142_vm1, %v4880_v47  ;;  %v4900_v56 = vpack.c.bf16 %v848_v53, %v852_v54  ;;  %v6245_v59 = vunpack.c.l.bf16 %v4878_v46  ;;  %v802_v61 = vrot.slane %v6251_v55, 7  ;;  %v6244_v62 = vunpack.c.h.bf16 %v4878_v46 }
  0x24   : > { %4230 = vmatmul.mubr.msk.bf16.vlgmr.msra.gmra.mxu1 %vm1142_vm1, %v4891_v52  ;;  %v474_v63 = vand.u32 15, %v4809_v12  ;;  %v249_v0 = vunpack.c.l.bf16 %v4889_v51  ;;  %vm4923_vm6 = vcmp.eq.s32.totalorder %v460_v58, 0  ;;  %v803_v3 = vrot.slane %v6249_v57, 7 }
  0x25   : > { %4246 = vmatpush3.bf16.msra.mxu1 %v1503_v9  ;;  %4214 = vmatmul.mubr.msk.bf16.vlgmr.msra.gmra.mxu0 %vm1142_vm1, %v4900_v56  ;;  %v804_v4 = vrot.slane %v6245_v59, 7  ;;  %v250_v7 = vunpack.c.h.bf16 %v4889_v51  ;;  %v831_v8 = vsel %vm816_vm2, %v801_v35, %v802_v61  ;;  %v805_v10 = vrot.slane %v6244_v62, 7 }
  0x26   : > { %vm4934_vm7 = vcmp.eq.s32.totalorder %v474_v63, 0  ;;  %4280 = vmatpush3.bf16.msra.mxu0 %v4812_v13  ;;  %v348_v11 = vand.u32 15, %v284_v27  ;;  %4523 = vmatprep.subr.msk.bf16.mxu1 %vm1191_vm0, %v4907_v60  ;;  %v830_v12 = vsel %vm816_vm2, %v802_v61, %v803_v3  ;;  %v870_v16 = vsel %vm4923_vm6, 0.0, %v831_v8 }
  0x27   : > { %v829_v18 = vsel %vm816_vm2, %v803_v3, %v804_v4  ;;  %v786_v19 = vrot.slane %v249_v0, 7  ;;  %4524 = vmatprep.subr.msk.bf16.mxu0 %vm1191_vm0, %v4919_v1  ;;  %v4954_v13 = vpack.c.bf16 %v830_v12, %v870_v16  ;;  %v828_v27 = vsel %vm816_vm2, %v804_v4, %v805_v10 }
  0x28   : > { %v872_v31 = vsel %vm4934_vm7, 0.0, %v829_v18  ;;  %vm4960_vm8 = vcmp.eq.s32.totalorder %v348_v11, 0  ;;  %v787_v35 = vrot.slane %v250_v7, 7  ;;  %v4973_v37 = vrot.slane %v249_v0, 1  ;;  %v5016_v11 = vld [vmem:[%s4804_s9 + $0x18] sm:$0xff]  }
  0x29   : > { %v4967_v34 = vpack.c.bf16 %v828_v27, %v872_v31  ;;  %v847_v36 = vsel %vm816_vm2, %v785_v45, %v786_v19  ;;  %4233 = vmatprep.mubr.msk.bf16.mxu1 %vm1142_vm1, %v4954_v13  ;;  %v251_v39 = vunpack.c.l.bf16 %v4950_v29  ;;  %v252_v40 = vunpack.c.h.bf16 %v4950_v29 }
  0x2a   : > { %v854_v38 = vsel %vm4960_vm8, 0.0, %v847_v36  ;;  %v362_v42 = vand.u32 15, %v4834_v28  ;;  %v846_v44 = vsel %vm816_vm2, %v786_v19, %v787_v35  ;;  %v6243_v45 = vunpack.c.l.bf16 %v4965_v33  ;;  %v5025_v19 = vld [vmem:[%s4804_s9 + $0x20] sm:$0xff]  }
  0x2b   : > { %v6242_v48 = vunpack.c.h.bf16 %v4965_v33  ;;  %v304_v49 = vadd.s32 192, %v4792_v5  ;;  %v4992_v53 = vpack.c.bf16 %v846_v44, %v854_v38  ;;  %v788_v28 = vrot.slane %v251_v39, 7 }
  0x2c   : > { %4234 = vmatmul.mubr.msk.bf16.gmra.mxu1 %vm1142_vm1, %v4967_v34  ;;  %vm4994_vm9 = vcmp.eq.s32.totalorder %v362_v42, 0  ;;  %v789_v58 = vrot.slane %v252_v40, 7  ;;  %v806_v63 = vrot.slane %v6243_v45, 7  ;;  %v6241_v2 = vunpack.c.l.bf16 %v4983_v43  ;;  %v5085_v45 = vld [vmem:[%s4804_s9 + $0x28] sm:$0xff]  }
  0x2d   : > { %v488_v61 = vand.u32 15, %v304_v49  ;;  %v807_v0 = vrot.slane %v6242_v48, 7  ;;  %4217 = vmatprep.mubr.msk.bf16.mxu0 %vm1142_vm1, %v4992_v53  ;;  %v845_v4 = vsel %vm816_vm2, %v787_v35, %v788_v28  ;;  %v6240_v8 = vunpack.c.h.bf16 %v4983_v43 }
  0x2e   : > { %v844_v3 = vsel %vm816_vm2, %v788_v28, %v789_v58  ;;  %v306_v9 = vadd.s32 208, %v4792_v5  ;;  %v856_v12 = vsel %vm4994_vm9, 0.0, %v845_v4  ;;  %v827_v18 = vsel %vm816_vm2, %v805_v10, %v806_v63  ;;  %v5044_v28 = vld [vmem:[%s4804_s9 + $0x68] sm:$0xff]  }
  0x2f   : > { %vm772_vm10 = vcmp.eq.s32.totalorder %v488_v61, 0  ;;  %v826_v16 = vsel %vm816_vm2, %v806_v63, %v807_v0  ;;  %v5027_v27 = vpack.c.bf16 %v844_v3, %v856_v12  ;;  %v808_v35 = vrot.slane %v6241_v2, 7 }
  0x30   : > { %v874_v31 = vsel %vm772_vm10, 0.0, %v827_v18  ;;  %v502_v32 = vand.u32 15, %v306_v9  ;;  %v809_v38 = vrot.slane %v6240_v8, 7  ;;  %v253_v42 = vunpack.c.l.bf16 %v5016_v11 }
  0x31   : > { %v5031_v36 = vpack.c.bf16 %v826_v16, %v874_v31  ;;  %v254_v44 = vunpack.c.h.bf16 %v5016_v11  ;;  %4218 = vmatmul.mubr.msk.bf16.gmra.mxu0 %vm1142_vm1, %v5027_v27  ;;  %v825_v10 = vsel %vm816_vm2, %v807_v0, %v808_v35  ;;  %v288_v49 = vadd.s32 64, %v4792_v5 }
  0x32   : > { %vm774_vm11 = vcmp.eq.s32.totalorder %v502_v32, 0  ;;  %v255_v54 = vunpack.c.l.bf16 %v5025_v19  ;;  %v824_v61 = vsel %vm816_vm2, %v808_v35, %v809_v38  ;;  %v790_v3 = vrot.slane %v253_v42, 7 }
  0x33   : > { %4237 = vmatprep.mubr.msk.bf16.mxu1 %vm1142_vm1, %v5031_v36  ;;  %v876_v63 = vsel %vm774_vm11, 0.0, %v825_v10  ;;  %v791_v0 = vrot.slane %v254_v44, 7  ;;  %v376_v9 = vand.u32 15, %v288_v49  ;;  %v256_v12 = vunpack.c.h.bf16 %v5025_v19 }
  0x34   : > { %v5054_v4 = vpack.c.bf16 %v824_v61, %v876_v63  ;;  %v290_v16 = vadd.s32 80, %v4792_v5  ;;  %v843_v31 = vsel %vm816_vm2, %v789_v58, %v790_v3  ;;  %v792_v32 = vrot.slane %v255_v54, 7  ;;  %v5071_v63 = vld [vmem:[%s4804_s9 + $0x70] sm:$0xff]  }
  0x35   : > { %v842_v18 = vsel %vm816_vm2, %v790_v3, %v791_v0  ;;  %v6247_v35 = vunpack.c.l.bf16 %v5044_v28  ;;  %vm756_vm12 = vcmp.eq.s32.totalorder %v376_v9, 0  ;;  %v793_v49 = vrot.slane %v256_v12, 7 }
  0x36   : > { %4238 = vmatmul.mubr.msk.bf16.gmra.mxu1 %vm1142_vm1, %v5054_v4  ;;  %v390_v10 = vand.u32 15, %v290_v16  ;;  %v6246_v61 = vunpack.c.h.bf16 %v5044_v28  ;;  %v858_v8 = vsel %vm756_vm12, 0.0, %v843_v31  ;;  %v841_v58 = vsel %vm816_vm2, %v791_v0, %v792_v32 }
  0x37   : > { %v308_v3 = vadd.s32 224, %v4792_v5  ;;  %v810_v2 = vrot.slane %v6247_v35, 7  ;;  %v5078_v48 = vpack.c.bf16 %v842_v18, %v858_v8  ;;  %v840_v9 = vsel %vm816_vm2, %v792_v32, %v793_v49 }
  0x38   : > { %vm758_vm13 = vcmp.eq.s32.totalorder %v390_v10, 0  ;;  %v811_v16 = vrot.slane %v6246_v61, 7  ;;  %v6248_v59 = vunpack.c.l.bf16 %v5071_v63  ;;  %v6250_v32 = vunpack.c.h.bf16 %v5071_v63 }
  0x39   : > { %v860_v31 = vsel %vm758_vm13, 0.0, %v841_v58  ;;  %v516_v62 = vand.u32 15, %v308_v3  ;;  %v823_v0 = vsel %vm816_vm2, %v809_v38, %v810_v2  ;;  %4221 = vmatprep.mubr.msk.bf16.mxu0 %vm1142_vm1, %v5078_v48  ;;  %v310_v10 = vadd.s32 240, %v4792_v5 }
  0x3a   : > { %v5092_v8 = vpack.c.bf16 %v840_v9, %v860_v31  ;;  %v822_v18 = vsel %vm816_vm2, %v810_v2, %v811_v16  ;;  %v812_v58 = vrot.slane %v6248_v59, 7  ;;  %v257_v38 = vunpack.c.l.bf16 %v5085_v45 }
  0x3b   : > { %vm776_vm14 = vcmp.eq.s32.totalorder %v516_v62, 0  ;;  %v258_v3 = vunpack.c.h.bf16 %v5085_v45  ;;  %v530_v31 = vand.u32 15, %v310_v10  ;;  %v5106_v2 = vrot.slane %v6250_v32, 7 }
  0x3c   : > { %4222 = vmatmul.mubr.msk.bf16.gmra.mxu0 %vm1142_vm1, %v5092_v8  ;;  %v878_v9 = vsel %vm776_vm14, 0.0, %v823_v0  ;;  %v292_v61 = vadd.s32 96, %v4792_v5  ;;  %v821_v62 = vsel %vm816_vm2, %v811_v16, %v812_v58  ;;  %v794_v59 = vrot.slane %v257_v38, 7 }
  0x3d   : > { %v5109_v35 = vpack.c.bf16 %v822_v18, %v878_v9  ;;  %v795_v57 = vrot.slane %v258_v3, 7  ;;  %vm778_vm15 = vcmp.eq.s32.totalorder %v530_v31, 0  ;;  %v820_v0 = vsel %vm816_vm2, %v812_v58, %v5106_v2 }
  0x3e   : > { %v404_v10 = vand.u32 15, %v292_v61  ;;  %v259_v32 = vunpack.c.l.bf16 %v4815_v14  ;;  %v880_v18 = vsel %vm778_vm15, 0.0, %v821_v62  ;;  %v839_v9 = vsel %vm816_vm2, %v793_v49, %v794_v59 }
  0x3f   : > { %4241 = vmatprep.mubr.msk.bf16.mxu1 %vm1142_vm1, %v5109_v35  ;;  %v838_v16 = vsel %vm816_vm2, %v794_v59, %v795_v57  ;;  %v294_v55 = vadd.s32 112, %v4792_v5  ;;  %v5128_v31 = vpack.c.bf16 %v820_v0, %v880_v18  ;;  %v281_v58 = vadd.s32 8, %v4792_v5 }
  0x40   : > { %vm760_vm3 = vcmp.eq.s32.totalorder %v404_v10, 0  ;;  %v796_v61 = vrot.slane %v259_v32, 7  ;;  %v283_v62 = vadd.s32 24, %v4792_v5  ;;  %v922_v22 = vrot.slane %v247_v26, 1 }
  0x41   : > { %v862_v25 = vsel %vm760_vm3, 0.0, %v839_v9  ;;  %v418_v23 = vand.u32 15, %v294_v55  ;;  %4242 = vmatmul.mubr.msk.bf16.gmra.mxu1 %vm1142_vm1, %v5128_v31  ;;  %v327_v10 = vand.u32 15, %v281_v58  ;;  %vm954_vm5 = vcmp.lt.s32.totalorder %v4792_v5, 7 }
  0x42   : > { %v5138_v59 = vpack.c.bf16 %v838_v16, %v862_v25  ;;  %v836_v49 = vsel %vm816_vm2, %v796_v61, %v4842_v30  ;;  %v837_v0 = vsel %vm816_vm2, %v795_v57, %v796_v61  ;;  %4247 = vmatprep.mubr.bf16.mxu1 %v6255_v6  ;;  %v341_v55 = vand.u32 15, %v283_v62 }
  0x43   : > { %vm762_vm4 = vcmp.eq.s32.totalorder %v418_v23, 0  ;;  %v2078_v25 = vsel %vm1191_vm0, %v4907_v60, 0  ;;  %vm887_vm6 = vcmp.eq.s32.totalorder %v327_v10, 15  ;;  %v985_v30 = vsel %vm954_vm5, %v4886_v50, %v4973_v37 }
  0x44   : > { %4225 = vmatprep.mubr.msk.bf16.mxu0 %vm1142_vm1, %v5138_v59  ;;  %v864_v26 = vsel %vm762_vm4, 0.0, %v837_v0  ;;  %vm5157_vm7 = vcmp.eq.s32.totalorder %v341_v55, 15  ;;  %v987_v18 = vsel %vm954_vm5, 0.0, %v922_v22  ;;  %v986_v16 = vsel %vm954_vm5, %v922_v22, %v4886_v50 }
  0x45   : > { %v5155_v57 = vpack.c.bf16 %v836_v49, %v864_v26  ;;  %v989_v60 = vsel %vm887_vm6, 0.0, %v987_v18  ;;  %v285_v9 = vadd.s32 40, %v4792_v5  ;;  %v991_v61 = vsel %vm5157_vm7, 0.0, %v985_v30 }
  0x46   : > { %v6257_v58 = vmov 0.0   ;;  %v925_v49 = vrot.slane %v250_v7, 1  ;;  %v926_v0 = vrot.slane %v251_v39, 1  ;;  %v287_v22 = vadd.s32 56, %v4792_v5 }
  0x47   : > { %4226 = vmatmul.mubr.msk.bf16.gmra.mxu0 %vm1142_vm1, %v5155_v57  ;;  %v1059_v62 = vpack.c.bf16 %v989_v60, %v6257_v58  ;;  %v355_v10 = vand.u32 15, %v285_v9  ;;  %v927_v50 = vrot.slane %v252_v40, 1  ;;  %v928_v55 = vrot.slane %v253_v42, 1  ;;  %v5194_v40 = vld [vmem:[%s6237_s1 + $0xa] sm:$0x3] }
  0x48   : > { %v5183_v26 = vrot.slane %v261_v21, 1  ;;  %v983_v7 = vsel %vm954_vm5, %v925_v49, %v926_v0  ;;  %v984_v39 = vsel %vm954_vm5, %v4973_v37, %v925_v49  ;;  %v5198_v42 = vpack.c.bf16 %v991_v61, %v986_v16 }
  0x49   : > { %4281 = vmatprep.mubr.msk.bf16.mxu0 %vm1142_vm1, %v1059_v62  ;;  %4248 = vmatmul.mubr.msk.bf16.vlgmr.msra.gmra.mxu1 %vm1142_vm1, %v4828_v24  ;;  %vm891_vm8 = vcmp.eq.s32.totalorder %v355_v10, 15  ;;  %v369_v21 = vand.u32 15, %v287_v22  ;;  %v981_v30 = vsel %vm954_vm5, %v927_v50, %v928_v55  ;;  %v289_v23 = vadd.s32 72, %v4792_v5 }
  0x4a   : > { %4314 = vmatpush3.bf16.msra.mxu1 %v2078_v25  ;;  %4251 = vmatprep.mubr.msk.bf16.mxu1 %vm1142_vm1, %v4889_v51  ;;  %v993_v37 = vsel %vm891_vm8, 0.0, %v983_v7  ;;  %v929_v18 = vrot.slane %v254_v44, 1  ;;  %v930_v60 = vrot.slane %v255_v54, 1  ;;  %v291_v25 = vadd.s32 88, %v4792_v5  ;;  %v5233_v7 = vld [vmem:[%s6237_s1 + $0xc] sm:$0x3] }
  0x4b   : > { %v5209_v16 = vpack.c.bf16 %v993_v37, %v984_v39  ;;  %vm5211_vm9 = vcmp.eq.s32.totalorder %v369_v21, 15  ;;  %v931_v61 = vrot.slane %v256_v12, 1  ;;  %4525 = vmatprep.subr.msk.bf16.mxu1 %vm1191_vm0, %v5194_v40  ;;  %v2343_v44 = vsel %vm1191_vm0, %v4919_v1, 0 }
  0x4c   : > { %v383_v62 = vand.u32 15, %v289_v23  ;;  %v979_v54 = vsel %vm954_vm5, %v929_v18, %v930_v60  ;;  %v982_v49 = vsel %vm954_vm5, %v926_v0, %v927_v50  ;;  %v995_v10 = vsel %vm5211_vm9, 0.0, %v981_v30 }
  0x4d   : > { %v397_v22 = vand.u32 15, %v291_v25  ;;  %v932_v12 = vrot.slane %v257_v38, 1  ;;  %v980_v0 = vsel %vm954_vm5, %v928_v55, %v929_v18  ;;  %v293_v50 = vadd.s32 104, %v4792_v5 }
  0x4e   : > { %vm5237_vm10 = vcmp.eq.s32.totalorder %v383_v62, 15  ;;  %v933_v30 = vrot.slane %v258_v3, 1  ;;  %v5256_v55 = vpack.c.bf16 %v995_v10, %v982_v49  ;;  %v934_v23 = vrot.slane %v259_v32, 1 }
  0x4f   : > { %4282 = vmatmul.mubr.msk.bf16.vlgmr.msra.gmra.mxu0 %vm1142_vm1, %v5198_v42  ;;  %v997_v38 = vsel %vm5237_vm10, 0.0, %v979_v54  ;;  %vm5248_vm11 = vcmp.eq.s32.totalorder %v397_v22, 15  ;;  %v977_v21 = vsel %vm954_vm5, %v931_v61, %v932_v12  ;;  %v411_v37 = vand.u32 15, %v293_v50 }
  0x50   : > { %4348 = vmatpush3.bf16.msra.mxu0 %v2343_v44  ;;  %4285 = vmatprep.mubr.msk.bf16.mxu0 %vm1142_vm1, %v5209_v16  ;;  %v978_v18 = vsel %vm954_vm5, %v930_v60, %v931_v61  ;;  %v295_v9 = vadd.s32 120, %v4792_v5  ;;  %v935_v3 = vrot.slane %v260_v20, 1  ;;  %v5271_v25 = vpack.c.bf16 %v997_v38, %v980_v0 }
  0x51   : > { %4526 = vmatprep.subr.msk.bf16.mxu0 %vm1191_vm0, %v5233_v7  ;;  %4252 = vmatmul.mubr.msk.bf16.gmra.mxu1 %vm1142_vm1, %v4950_v29  ;;  %v999_v32 = vsel %vm5248_vm11, 0.0, %v977_v21  ;;  %vm5275_vm12 = vcmp.eq.s32.totalorder %v411_v37, 15  ;;  %v975_v60 = vsel %vm954_vm5, %v933_v30, %v934_v23  ;;  %v976_v61 = vsel %vm954_vm5, %v932_v12, %v933_v30 }
  0x52   : > { %4255 = vmatprep.mubr.msk.bf16.mxu1 %vm1142_vm1, %v5016_v11  ;;  %v1001_v20 = vsel %vm5275_vm12, 0.0, %v975_v60  ;;  %v425_v62 = vand.u32 15, %v295_v9  ;;  %v973_v54 = vsel %vm954_vm5, %v935_v3, %v5183_v26  ;;  %v974_v49 = vsel %vm954_vm5, %v934_v23, %v935_v3 }
  0x53   : > { %v297_v10 = vadd.s32 136, %v4792_v5  ;;  %v6286_v22 = vunpack.c.h.bf16 %v4818_v15  ;;  %v6287_v0 = vunpack.c.l.bf16 %v4821_v17  ;;  %v299_v12 = vadd.s32 152, %v4792_v5 }
  0x54   : > { %vm901_vm13 = vcmp.eq.s32.totalorder %v425_v62, 15  ;;  %v6288_v38 = vunpack.c.h.bf16 %v4821_v17  ;;  %v6289_v21 = vunpack.c.l.bf16 %v4869_v41  ;;  %v311_v6 = vadd.s32 248, %v4792_v5 }
  0x55   : > { %v937_v1 = vrot.slane %v6286_v22, 1  ;;  %v938_v50 = vrot.slane %v6287_v0, 1  ;;  %v1003_v37 = vsel %vm901_vm13, 0.0, %v973_v54  ;;  %v439_v23 = vand.u32 15, %v297_v10 }
  0x56   : > { %v939_v39 = vrot.slane %v6288_v38, 1  ;;  %v940_v30 = vrot.slane %v6289_v21, 1  ;;  %v5309_v44 = vpack.c.bf16 %v1003_v37, %v974_v49  ;;  %v453_v60 = vand.u32 15, %v299_v12 }
  0x57   : > { %4286 = vmatmul.mubr.msk.bf16.gmra.mxu0 %vm1142_vm1, %v5256_v55  ;;  %v971_v9 = vsel %vm954_vm5, %v937_v1, %v938_v50  ;;  %v972_v3 = vsel %vm954_vm5, %v5183_v26, %v937_v1  ;;  %v5315_v10 = vpack.c.bf16 %v999_v32, %v978_v18  ;;  %v5317_v22 = vpack.c.bf16 %v1001_v20, %v976_v61 }
  0x58   : > { %4289 = vmatprep.mubr.msk.bf16.mxu0 %vm1142_vm1, %v5271_v25  ;;  %v969_v62 = vsel %vm954_vm5, %v939_v39, %v940_v30  ;;  %v970_v54 = vsel %vm954_vm5, %v938_v50, %v939_v39  ;;  %vm903_vm14 = vcmp.eq.s32.totalorder %v439_v23, 15  ;;  %v301_v0 = vadd.s32 168, %v4792_v5 }
  0x59   : > { %6290 = vst [vmem:[#allocation5_spill] sm:$0xff] %v5317_v22  ;;  %4256 = vmatmul.mubr.msk.bf16.gmra.mxu1 %vm1142_vm1, %v5025_v19  ;;  %v1005_v26 = vsel %vm903_vm14, 0.0, %v971_v9  ;;  %vm905_vm15 = vcmp.eq.s32.totalorder %v453_v60, 15  ;;  %v6291_v49 = vunpack.c.h.bf16 %v4869_v41  ;;  %v6292_v12 = vunpack.c.l.bf16 %v4878_v46 }
  0x5a   : > { %4259 = vmatprep.mubr.msk.bf16.mxu1 %vm1142_vm1, %v5085_v45  ;;  %v5328_v18 = vpack.c.bf16 %v1005_v26, %v972_v3  ;;  %v1007_v32 = vsel %vm905_vm15, 0.0, %v969_v62  ;;  %v467_v61 = vand.u32 15, %v301_v0  ;;  %v303_v20 = vadd.s32 184, %v4792_v5 }
  0x5b   : > { %v941_v1 = vrot.slane %v6291_v49, 1  ;;  %v942_v38 = vrot.slane %v6292_v12, 1  ;;  %v5331_v50 = vpack.c.bf16 %v1007_v32, %v970_v54  ;;  %v6293_v37 = vunpack.c.h.bf16 %v4878_v46 }
  0x5c   : > { %vm907_vm3 = vcmp.eq.s32.totalorder %v467_v61, 15  ;;  %v481_v9 = vand.u32 15, %v303_v20  ;;  %v6294_v3 = vunpack.c.l.bf16 %v4965_v33  ;;  %v305_v54 = vadd.s32 200, %v4792_v5 }
  0x5d   : > { %v967_v39 = vsel %vm954_vm5, %v941_v1, %v942_v38  ;;  %v968_v21 = vsel %vm954_vm5, %v940_v30, %v941_v1  ;;  %v943_v23 = vrot.slane %v6293_v37, 1  ;;  %v6295_v49 = vunpack.c.h.bf16 %v4965_v33 }
  0x5e   : > { %v944_v60 = vrot.slane %v6294_v3, 1  ;;  %v1009_v62 = vsel %vm907_vm3, 0.0, %v967_v39  ;;  %vm909_vm4 = vcmp.eq.s32.totalorder %v481_v9, 15  ;;  %v6296_v32 = vunpack.c.l.bf16 %v4983_v43 }
  0x5f   : > { %v966_v0 = vsel %vm954_vm5, %v942_v38, %v943_v23  ;;  %4290 = vmatmul.mubr.msk.bf16.gmra.mxu0 %vm1142_vm1, %v5315_v10  ;;  %v5346_v26 = vpack.c.bf16 %v1009_v62, %v968_v21  ;;  %v945_v1 = vrot.slane %v6295_v49, 1  ;;  %v495_v38 = vand.u32 15, %v305_v54 }
  0x60   : > { %v965_v30 = vsel %vm954_vm5, %v943_v23, %v944_v60  ;;  %4293 = vmatprep.mubr.msk.bf16.mxu0 %vm1142_vm1, %v5317_v22  ;;  %v946_v61 = vrot.slane %v6296_v32, 1  ;;  %v307_v20 = vadd.s32 216, %v4792_v5  ;;  %v6297_v37 = vunpack.c.h.bf16 %v4983_v43 }
  0x61   : > { %v1011_v12 = vsel %vm909_vm4, 0.0, %v965_v30  ;;  %v964_v21 = vsel %vm954_vm5, %v944_v60, %v945_v1  ;;  %v6298_v9 = vunpack.c.l.bf16 %v5044_v28  ;;  %4260 = vmatmul.mubr.msk.bf16.gmra.mxu1 %vm1142_vm1, %v4815_v14  ;;  %vm911_vm6 = vcmp.eq.s32.totalorder %v495_v38, 15  ;;  %v5370_v30 = vld [vmem:[%s4804_s9 + $0x78] sm:$0xff]   ;;  %s6045_s9 = scalar_lea.vmem [#allocation2], %s3883_s8 }
  0x62   : > { %v5357_v39 = vpack.c.bf16 %v1011_v12, %v966_v0  ;;  %v947_v23 = vrot.slane %v6297_v37, 1  ;;  %v963_v62 = vsel %vm954_vm5, %v945_v1, %v946_v61  ;;  %v509_v54 = vand.u32 15, %v307_v20  ;;  %4263 = vmatprep.mubr.msk.bf16.mxu1 %vm1142_vm1, %v4818_v15  ;;  %s3777_s11 = sshll.u32 %s6045_s9, 4  ;;  %s6185_s11 = int_to_ptr.vmem [resolvable:$true] %s3777_s11 }
  0x63   : > { %v948_v3 = vrot.slane %v6298_v9, 1  ;;  %v1013_v60 = vsel %vm911_vm6, 0.0, %v963_v62  ;;  %v309_v38 = vadd.s32 232, %v4792_v5  ;;  %v6299_v1 = vunpack.c.h.bf16 %v5044_v28  ;;  %s4620_s23 = scalar_lea.vmem %s6185_s11, 4096  ;;  %p4627_p1 = scmp.lt.s32.totalorder %s6185_s11, %s4625_s27 }
  0x64   : > { %v962_v49 = vsel %vm954_vm5, %v946_v61, %v947_v23  ;;  %v5378_v12 = vpack.c.bf16 %v1013_v60, %v964_v21  ;;  %vm913_vm7 = vcmp.eq.s32.totalorder %v509_v54, 15  ;;  %v6300_v37 = vunpack.c.l.bf16 %v5071_v63  ;;  %p4621_p12 = scmp.ne.s32.totalorder %s6185_s11, %s4620_s23  ;;  %p4628_p2 = scmp.lt.s32.totalorder %s4626_s28, %s4620_s23 }
  0x65   : > { %v961_v0 = vsel %vm954_vm5, %v947_v23, %v948_v3  ;;  %v949_v32 = vrot.slane %v6299_v1, 1  ;;  %v277_v62 = vunpack.c.l.bf16 %v5370_v30  ;;  %v523_v22 = vand.u32 15, %v309_v38 }
  0x66   : > { %v1015_v20 = vsel %vm913_vm7, 0.0, %v961_v0  ;;  %v950_v9 = vrot.slane %v6300_v37, 1  ;;  %v6301_v21 = vunpack.c.h.bf16 %v5071_v63  ;;  %v537_v60 = vand.u32 15, %v311_v6  ;;  %p4622_p13 = pnand %p4621_p12, %p4763_p4  ;;  %p4629_p3 = por %p4628_p2, %p4627_p1 }
  0x67   : > { %v5387_v58 = vpack.c.bf16 %v1015_v20, %v962_v49  ;;  %v960_v61 = vsel %vm954_vm5, %v948_v3, %v949_v32  ;;  %4294 = vmatmul.mubr.msk.bf16.gmra.mxu0 %vm1142_vm1, %v5309_v44  ;;  %v952_v0 = vrot.slane %v277_v62, 1  ;;  %vm915_vm8 = vcmp.eq.s32.totalorder %v523_v22, 15 }
  0x68   : > { %v951_v23 = vrot.slane %v6301_v21, 1  ;;  %v959_v54 = vsel %vm954_vm5, %v949_v32, %v950_v9  ;;  %4297 = vmatprep.mubr.msk.bf16.mxu0 %vm1142_vm1, %v5328_v18  ;;  %v278_v3 = vunpack.c.h.bf16 %v5370_v30  ;;  %vm917_vm9 = vcmp.eq.s32.totalorder %v537_v60, 15  ;;  %p4623_p0 = pneg %p4622_p13 }
  0x69   : > { %v1017_v38 = vsel %vm915_vm8, 0.0, %v959_v54  ;;  %v312_v20 = vadd.s32 256, %v4792_v5  ;;  %4264 = vmatmul.mubr.msk.bf16.gmra.mxu1 %vm1142_vm1, %v4821_v17  ;;  %v814_v37 = vrot.slane %v277_v62, 7 }
  0x6a   : > { %v958_v49 = vsel %vm954_vm5, %v950_v9, %v951_v23  ;;  %v957_v1 = vsel %vm954_vm5, %v951_v23, %v952_v0  ;;  %v5407_v6 = vpack.c.bf16 %v1017_v38, %v960_v61  ;;  %v5409_v22 = vrot.slane %v278_v3, 7  ;;  %4267 = vmatprep.mubr.msk.bf16.mxu1 %vm1142_vm1, %v4869_v41  ;;  %p4630_p5 = pnand %p4629_p3, %p4623_p0 }
  0x6b   : > { %v1019_v32 = vsel %vm917_vm9, 0.0, %v957_v1  ;;  %v544_v21 = vand.u32 15, %v312_v20  ;;  %v819_v54 = vsel %vm816_vm2, %v5106_v2, %v814_v37  ;;  %v313_v2 = vadd.s32 264, %v4792_v5 }
  0x6c   : > { %v5413_v9 = vpack.c.bf16 %v1019_v32, %v958_v49  ;;  %v818_v23 = vsel %vm816_vm2, %v814_v37, %v5409_v22  ;;  %v953_v49 = vrot.slane %v278_v3, 1  ;;  %v2608_v37 = vsel %vm1191_vm0, %v5194_v40, 0 }
  0x6d   : > { %vm780_vm10 = vcmp.eq.s32.totalorder %v544_v21, 0  ;;  %v551_v60 = vand.u32 15, %v313_v2  ;;  %v314_v2 = vadd.s32 272, %v4792_v5 }
  0x6e   : > { %v882_v61 = vsel %vm780_vm10, 0.0, %v819_v54  ;;  %v955_v38 = vsel %vm954_vm5, %v953_v49, 0.0  ;;  %v956_v1 = vsel %vm954_vm5, %v952_v0, %v953_v49  ;;  %v2873_v0 = vsel %vm1191_vm0, %v5233_v7, 0 }
  0x6f   : > { %4298 = vmatmul.mubr.msk.bf16.gmra.mxu0 %vm1142_vm1, %v5331_v50  ;;  %v5423_v62 = vpack.c.bf16 %v818_v23, %v882_v61  ;;  %vm919_vm11 = vcmp.eq.s32.totalorder %v551_v60, 15 }
  0x70   : > { %4301 = vmatprep.mubr.msk.bf16.mxu0 %vm1142_vm1, %v5346_v26  ;;  %v1021_v20 = vsel %vm919_vm11, 0.0, %v955_v38  ;;  %v558_v38 = vand.u32 15, %v314_v2 }
  0x71   : > { %4268 = vmatmul.mubr.msk.bf16.gmra.mxu1 %vm1142_vm1, %v4878_v46  ;;  %v5452_v32 = vpack.c.bf16 %v1021_v20, %v956_v1 }
  0x72   : > { %4271 = vmatprep.mubr.msk.bf16.mxu1 %vm1142_vm1, %v4965_v33 }
  0x77   : > { %4302 = vmatmul.mubr.msk.bf16.gmra.mxu0 %vm1142_vm1, %v5357_v39 }
  0x78   : > { %4305 = vmatprep.mubr.msk.bf16.mxu0 %vm1142_vm1, %v5378_v12 }
  0x79   : > { %4272 = vmatmul.mubr.msk.bf16.gmra.mxu1 %vm1142_vm1, %v4983_v43 }
  0x7a   : > { %4275 = vmatprep.mubr.msk.bf16.mxu1 %vm1142_vm1, %v5044_v28 }
  0x7f   : > { %4306 = vmatmul.mubr.msk.bf16.gmra.mxu0 %vm1142_vm1, %v5387_v58 }
  0x80   : > { %4309 = vmatprep.mubr.msk.bf16.mxu0 %vm1142_vm1, %v5407_v6 }
  0x81   : > { %4276 = vmatmul.mubr.msk.bf16.gmra.mxu1 %vm1142_vm1, %v5071_v63 }
  0x82   : > { %4315 = vmatprep.mubr.msk.bf16.mxu1 %vm1142_vm1, %v4900_v56  ;;  %v4018_v56 = vld [vmem:[%s6237_s1 + $0xe] sm:$0x3] }
  0x83   : > { %v3135_v40 = vsel %vm1191_vm0, %v4018_v56, 0 }
  0x87   : > { %4310 = vmatmul.mubr.msk.bf16.gmra.mxu0 %vm1142_vm1, %v5413_v9 }
  0x88   : > { %4349 = vmatprep.mubr.msk.bf16.mxu0 %vm1142_vm1, %v4828_v24  ;;  %v4034_v24 = vld [vmem:[%s6237_s1 + $0x10] sm:$0x3] }
  0x89   : > { %4316 = vmatmul.mubr.msk.bf16.vlgmr.msra.gmra.mxu1 %vm1142_vm1, %v4992_v53  ;;  %v3400_v7 = vsel %vm1191_vm0, %v4034_v24, 0 }
  0x8a   : > { %4382 = vmatpush3.bf16.msra.mxu1 %v2608_v37  ;;  %4319 = vmatprep.mubr.msk.bf16.mxu1 %vm1142_vm1, %v5027_v27 }
  0x8b   : > { %4527 = vmatprep.subr.msk.bf16.mxu1 %vm1191_vm0, %v4018_v56 }
  0x8f   : > { %4350 = vmatmul.mubr.msk.bf16.vlgmr.msra.gmra.mxu0 %vm1142_vm1, %v4889_v51 }
  0x90   : > { %4416 = vmatpush3.bf16.msra.mxu0 %v2873_v0  ;;  %4353 = vmatprep.mubr.msk.bf16.mxu0 %vm1142_vm1, %v4950_v29 }
  0x91   : > { %4528 = vmatprep.subr.msk.bf16.mxu0 %vm1191_vm0, %v4034_v24  ;;  %4320 = vmatmul.mubr.msk.bf16.gmra.mxu1 %vm1142_vm1, %v5078_v48  ;;  %vm782_vm0 = vcmp.eq.s32.totalorder %v558_v38, 0 }
  0x92   : > { %4323 = vmatprep.mubr.msk.bf16.mxu1 %vm1142_vm1, %v5092_v8 }
  0x97   : > { %4354 = vmatmul.mubr.msk.bf16.gmra.mxu0 %vm1142_vm1, %v5016_v11 }
  0x98   : > { %4357 = vmatprep.mubr.msk.bf16.mxu0 %vm1142_vm1, %v5025_v19 }
  0x99   : > { %4324 = vmatmul.mubr.msk.bf16.gmra.mxu1 %vm1142_vm1, %v5138_v59 }
  0x9a   : > { %4327 = vmatprep.mubr.msk.bf16.mxu1 %vm1142_vm1, %v5155_v57 }
  0x9f   : > { %4358 = vmatmul.mubr.msk.bf16.gmra.mxu0 %vm1142_vm1, %v5085_v45 }
  0xa0   : > { %4361 = vmatprep.mubr.msk.bf16.mxu0 %vm1142_vm1, %v4815_v14 }
  0xa1   : > { %4328 = vmatmul.mubr.msk.bf16.gmra.mxu1 %vm1142_vm1, %v4880_v47 }
  0xa2   : > { %4331 = vmatprep.mubr.msk.bf16.mxu1 %vm1142_vm1, %v4891_v52 }
  0xa7   : > { %4362 = vmatmul.mubr.msk.bf16.gmra.mxu0 %vm1142_vm1, %v4818_v15 }
  0xa8   : > { %4365 = vmatprep.mubr.msk.bf16.mxu0 %vm1142_vm1, %v4821_v17 }
  0xa9   : > { %4332 = vmatmul.mubr.msk.bf16.gmra.mxu1 %vm1142_vm1, %v4954_v13 }
  0xaa   : > { %4335 = vmatprep.mubr.msk.bf16.mxu1 %vm1142_vm1, %v4967_v34 }
  0xaf   : > { %4366 = vmatmul.mubr.msk.bf16.gmra.mxu0 %vm1142_vm1, %v4869_v41 }
  0xb0   : > { %4369 = vmatprep.mubr.msk.bf16.mxu0 %vm1142_vm1, %v4878_v46 }
  0xb1   : > { %4336 = vmatmul.mubr.msk.bf16.gmra.mxu1 %vm1142_vm1, %v5031_v36 }
  0xb2   : > { %4339 = vmatprep.mubr.msk.bf16.mxu1 %vm1142_vm1, %v5054_v4 }
  0xb7   : > { %4370 = vmatmul.mubr.msk.bf16.gmra.mxu0 %vm1142_vm1, %v4965_v33 }
  0xb8   : > { %4373 = vmatprep.mubr.msk.bf16.mxu0 %vm1142_vm1, %v4983_v43 }
  0xb9   : > { %4340 = vmatmul.mubr.msk.bf16.gmra.mxu1 %vm1142_vm1, %v5109_v35 }
  0xba   : > { %4343 = vmatprep.mubr.msk.bf16.mxu1 %vm1142_vm1, %v5128_v31 }
  0xbf   : > { %4374 = vmatmul.mubr.msk.bf16.gmra.mxu0 %vm1142_vm1, %v5044_v28 }
  0xc0   : > { %4377 = vmatprep.mubr.msk.bf16.mxu0 %vm1142_vm1, %v5071_v63 }
  0xc1   : > { %4344 = vmatmul.mubr.msk.bf16.gmra.mxu1 %vm1142_vm1, %v5423_v62 }
  0xc2   : > { %4383 = vmatprep.mubr.msk.bf16.mxu1 %vm1142_vm1, %v5198_v42 }
  0xc7   : > { %4378 = vmatmul.mubr.msk.bf16.gmra.mxu0 %vm1142_vm1, %v5370_v30 }
  0xc8   : > { %4417 = vmatprep.mubr.msk.bf16.mxu0 %vm1142_vm1, %v4992_v53  ;;  %v6302_v53 = vld [vmem:[#allocation5_spill] sm:$0xff] }
  0xc9   : > { %4384 = vmatmul.mubr.msk.bf16.vlgmr.msra.gmra.mxu1 %vm1142_vm1, %v5209_v16 }
  0xca   : > { %4450 = vmatpush3.bf16.msra.mxu1 %v3135_v40  ;;  %4387 = vmatprep.mubr.msk.bf16.mxu1 %vm1142_vm1, %v5256_v55 }
  0xcf   : > { %4418 = vmatmul.mubr.msk.bf16.vlgmr.msra.gmra.mxu0 %vm1142_vm1, %v5027_v27 }
  0xd0   : > { %4484 = vmatpush3.bf16.msra.mxu0 %v3400_v7  ;;  %4421 = vmatprep.mubr.msk.bf16.mxu0 %vm1142_vm1, %v5078_v48 }
  0xd1   : > { %4388 = vmatmul.mubr.msk.bf16.gmra.mxu1 %vm1142_vm1, %v5271_v25 }
  0xd2   : > { %4391 = vmatprep.mubr.msk.bf16.mxu1 %vm1142_vm1, %v5315_v10 }
  0xd7   : > { %4422 = vmatmul.mubr.msk.bf16.gmra.mxu0 %vm1142_vm1, %v5092_v8 }
  0xd8   : > { %4425 = vmatprep.mubr.msk.bf16.mxu0 %vm1142_vm1, %v5138_v59 }
  0xd9   : > { %4392 = vmatmul.mubr.msk.bf16.gmra.mxu1 %vm1142_vm1, %v6302_v53 }
  0xda   : > { %4395 = vmatprep.mubr.msk.bf16.mxu1 %vm1142_vm1, %v5309_v44 }
  0xdf   : > { %4426 = vmatmul.mubr.msk.bf16.gmra.mxu0 %vm1142_vm1, %v5155_v57 }
  0xe0   : > { %4429 = vmatprep.mubr.msk.bf16.mxu0 %vm1142_vm1, %v4880_v47 }
  0xe1   : > { %4396 = vmatmul.mubr.msk.bf16.gmra.mxu1 %vm1142_vm1, %v5328_v18 }
  0xe2   : > { %4399 = vmatprep.mubr.msk.bf16.mxu1 %vm1142_vm1, %v5331_v50 }
  0xe4   : > { %v5564_v48 = vpop.f32.mrf.mxu1 }
  0xe5   : > { %v4215_v27 = vpop.f32.mrf.mxu0 }
  0xe6   : > { %v5566_v8 = vpop.f32.mrf.mxu1 }
  0xe7   : > { %4430 = vmatmul.mubr.msk.bf16.gmra.mxu0 %vm1142_vm1, %v4891_v52  ;;  %v1229_v59 = vpop.f32.mrf.mxu0 }
  0xe8   : > { %4433 = vmatprep.mubr.msk.bf16.mxu0 %vm1142_vm1, %v4954_v13  ;;  %v5572_v57 = vpop.f32.mrf.mxu1 }
  0xe9   : > { %4400 = vmatmul.mubr.msk.bf16.gmra.mxu1 %vm1142_vm1, %v5346_v26  ;;  %v4216_v42 = vpop.f32.mrf.mxu0 }
  0xea   : > { %v5576_v47 = vpop.f32.mrf.mxu1  ;;  %4403 = vmatprep.mubr.msk.bf16.mxu1 %vm1142_vm1, %v5357_v39 }
  0xeb   : > { %v1232_v21 = vpop.f32.mrf.mxu0 }
  0xec   : > { %v5580_v3 = vpop.f32.mrf.mxu1 }
  0xee   : > { %v5582_v23 = vpop.f32.mrf.mxu1 }
  0xef   : > { %4434 = vmatmul.mubr.msk.bf16.gmra.mxu0 %vm1142_vm1, %v4967_v34 }
  0xf0   : > { %4437 = vmatprep.mubr.msk.bf16.mxu0 %vm1142_vm1, %v5031_v36  ;;  %v5588_v52 = vpop.f32.mrf.mxu1 }
  0xf1   : > { %4404 = vmatmul.mubr.msk.bf16.gmra.mxu1 %vm1142_vm1, %v5378_v12  ;;  %v4219_v13 = vpop.f32.mrf.mxu0 }
  0xf2   : > { %v5592_v54 = vpop.f32.mrf.mxu1  ;;  %4407 = vmatprep.mubr.msk.bf16.mxu1 %vm1142_vm1, %v5387_v58 }
  0xf3   : > { %v1245_v61 = vpop.f32.mrf.mxu0 }
  0xf5   : > { %v4220_v60 = vpop.f32.mrf.mxu0 }
  0xf6   : > { %v5597_v49 = vpop.f32.mrf.mxu1 }
  0xf7   : > { %4438 = vmatmul.mubr.msk.bf16.gmra.mxu0 %vm1142_vm1, %v5054_v4  ;;  %v5601_v34 = vpop.f32.mrf.mxu0  ;;  %v817_v4 = vsel %vm816_vm2, %v5409_v22, 0.0  ;;  %v6305_v22 = vmov 0.0  }
  0xf8   : > { %v5603_v36 = vpop.f32.mrf.mxu1  ;;  %4441 = vmatprep.mubr.msk.bf16.mxu0 %vm1142_vm1, %v5109_v35  ;;  %v884_v0 = vsel %vm782_vm0, 0.0, %v817_v4 }
  0xf9   : > { %4408 = vmatmul.mubr.msk.bf16.gmra.mxu1 %vm1142_vm1, %v5407_v6  ;;  %v1041_v40 = vpack.c.bf16 %v6305_v22, %v884_v0 }
  0xfa   : > { %v5609_v1 = vpop.f32.mrf.mxu1  ;;  %4411 = vmatprep.mubr.msk.bf16.mxu1 %vm1142_vm1, %v5413_v9 }
  0xfc   : > { %v4223_v20 = vpop.f32.mrf.mxu0  ;;  %v5618_v56 = vpop.f32.mrf.mxu1 }
  0xfd   : > { %6303 = vst [vmem:[#allocation5_spill] sm:$0xff] %v5618_v56 }
  0xfe   : > { %v5616_v37 = vpop.f32.mrf.mxu0 }
  0xff   : > { %4442 = vmatmul.mubr.msk.bf16.gmra.mxu0 %vm1142_vm1, %v5128_v31 }
 0x100   : > { %v5622_v35 = vpop.f32.mrf.mxu0  ;;  %4445 = vmatprep.mubr.msk.bf16.mxu0 %vm1142_vm1, %v5423_v62 }
 0x101   : > { %v5626_v24 = vpop.f32.mrf.mxu1  ;;  %4412 = vmatmul.mubr.msk.bf16.gmra.mxu1 %vm1142_vm1, %v5452_v32 }
 0x102   : > { %6304 = vst [vmem:[#allocation6_spill] sm:$0xff] %v5626_v24  ;;  %v5630_v5 = vpop.f32.mrf.mxu0  ;;  %4451 = vmatprep.mubr.msk.bf16.mxu1 %vm1142_vm1, %v4889_v51 }
 0x103   : > { %v5635_v7 = vpop.f32.mrf.mxu1 }
 0x104   : > { %6306 = vst [vmem:[#allocation7_spill] sm:$0xff] %v5635_v7 }
 0x105   : > { %v5637_v31 = vpop.f32.mrf.mxu1 }
 0x106   : > { %6307 = vst [vmem:[#allocation8_spill] sm:$0xff] %v5637_v31 }
 0x107   : > { %v5639_v2 = vpop.f32.mrf.mxu0  ;;  %4446 = vmatmul.mubr.msk.bf16.gmra.mxu0 %vm1142_vm1, %v1041_v40  ;;  %v5642_v62 = vpop.f32.mrf.mxu1 }
 0x108   : > { %6308 = vst [vmem:[#allocation9_spill] sm:$0xff] %v5642_v62  ;;  %4485 = vmatprep.mubr.msk.bf16.mxu0 %vm1142_vm1, %v5209_v16 }
 0x109   : > { %v5646_v38 = vpop.f32.mrf.mxu0  ;;  %v4249_v4 = vpop.f32.mrf.mxu1  ;;  %4452 = vmatmul.mubr.msk.bf16.vlgmr.msra.gmra.mxu1 %vm1142_vm1, %v4950_v29 }
 0x10a   : > { %v1668_v0 = vadd.f32 %v4249_v4, %v4215_v27  ;;  %4455 = vmatprep.mubr.msk.bf16.mxu1 %vm1142_vm1, %v5016_v11 }
 0x10b   : > { %v5650_v51 = vpop.f32.mrf.mxu0  ;;  %v1539_v22 = vpop.f32.mrf.mxu1 }
 0x10c   : > { %v1666_v40 = vadd.f32 %v1539_v22, %v1229_v59 }
 0x10d   : > { %v5654_v31 = vpop.f32.mrf.mxu0  ;;  %v4250_v62 = vpop.f32.mrf.mxu1 }
 0x10e   : > { %v1669_v7 = vadd.f32 %v4250_v62, %v4216_v42 }
 0x10f   : > { %v4283_v24 = vpop.f32.mrf.mxu0  ;;  %4486 = vmatmul.mubr.msk.bf16.vlgmr.msra.gmra.mxu0 %vm1142_vm1, %v5256_v55  ;;  %v1542_v56 = vpop.f32.mrf.mxu1 }
 0x110   : > { %v5658_v16 = vadd.f32 %v4283_v24, %v1668_v0  ;;  %4489 = vmatprep.mubr.msk.bf16.mxu0 %vm1142_vm1, %v5271_v25  ;;  %v1667_v29 = vadd.f32 %v1542_v56, %v1232_v21 }
 0x111   : > { %v1849_v27 = vpop.f32.mrf.mxu0  ;;  %v4253_v11 = vpop.f32.mrf.mxu1  ;;  %4456 = vmatmul.mubr.msk.bf16.gmra.mxu1 %vm1142_vm1, %v5025_v19 }
 0x112   : > { %v5662_v4 = vadd.f32 %v1849_v27, %v1666_v40  ;;  %v1672_v59 = vadd.f32 %v4253_v11, %v4219_v13  ;;  %4459 = vmatprep.mubr.msk.bf16.mxu1 %vm1142_vm1, %v5085_v45 }
 0x113   : > { %v4284_v42 = vpop.f32.mrf.mxu0  ;;  %v1555_v24 = vpop.f32.mrf.mxu1 }
 0x114   : > { %v5668_v55 = vadd.f32 %v4284_v42, %v1669_v7  ;;  %v1670_v62 = vadd.f32 %v1555_v24, %v1245_v61 }
 0x115   : > { %v1852_v0 = vpop.f32.mrf.mxu0  ;;  %v4254_v25 = vpop.f32.mrf.mxu1 }
 0x116   : > { %v5670_v22 = vadd.f32 %v1852_v0, %v1667_v29  ;;  %v1673_v21 = vadd.f32 %v4254_v25, %v4220_v60 }
 0x117   : > { %v4287_v56 = vpop.f32.mrf.mxu0  ;;  %4490 = vmatmul.mubr.msk.bf16.gmra.mxu0 %vm1142_vm1, %v5315_v10  ;;  %v1558_v19 = vpop.f32.mrf.mxu1 }
 0x118   : > { %v5674_v40 = vadd.f32 %v4287_v56, %v1672_v59  ;;  %4493 = vmatprep.mubr.msk.bf16.mxu0 %vm1142_vm1, %v6302_v53  ;;  %v1671_v45 = vadd.f32 %v1558_v19, %v5601_v34 }
 0x119   : > { %v1865_v13 = vpop.f32.mrf.mxu0  ;;  %v4257_v61 = vpop.f32.mrf.mxu1  ;;  %4460 = vmatmul.mubr.msk.bf16.gmra.mxu1 %vm1142_vm1, %v4815_v14 }
 0x11a   : > { %v5679_v7 = vadd.f32 %v1865_v13, %v1670_v62  ;;  %v1676_v60 = vadd.f32 %v4257_v61, %v4223_v20  ;;  %4463 = vmatprep.mubr.msk.bf16.mxu1 %vm1142_vm1, %v4818_v15 }
 0x11b   : > { %v4288_v29 = vpop.f32.mrf.mxu0  ;;  %v1571_v27 = vpop.f32.mrf.mxu1 }
 0x11c   : > { %v5685_v10 = vadd.f32 %v4288_v29, %v1673_v21  ;;  %v1674_v11 = vadd.f32 %v1571_v27, %v5616_v37 }
 0x11d   : > { %v1868_v53 = vpop.f32.mrf.mxu0  ;;  %v4258_v34 = vpop.f32.mrf.mxu1 }
 0x11e   : > { %v5688_v59 = vadd.f32 %v1868_v53, %v1671_v45  ;;  %v1677_v42 = vadd.f32 %v4258_v34, %v5622_v35 }
 0x11f   : > { %v4291_v24 = vpop.f32.mrf.mxu0  ;;  %4494 = vmatmul.mubr.msk.bf16.gmra.mxu0 %vm1142_vm1, %v5309_v44  ;;  %v1574_v20 = vpop.f32.mrf.mxu1 }
 0x120   : > { %v5693_v14 = vadd.f32 %v4291_v24, %v1676_v60  ;;  %4497 = vmatprep.mubr.msk.bf16.mxu0 %vm1142_vm1, %v5328_v18  ;;  %v1675_v15 = vadd.f32 %v1574_v20, %v5630_v5 }
 0x121   : > { %v1881_v62 = vpop.f32.mrf.mxu0  ;;  %v4261_v0 = vpop.f32.mrf.mxu1  ;;  %4464 = vmatmul.mubr.msk.bf16.gmra.mxu1 %vm1142_vm1, %v4821_v17 }
 0x122   : > { %v5698_v37 = vadd.f32 %v1881_v62, %v1674_v11  ;;  %v1680_v35 = vadd.f32 %v4261_v0, %v5639_v2  ;;  %4467 = vmatprep.mubr.msk.bf16.mxu1 %vm1142_vm1, %v4869_v41 }
 0x123   : > { %v4292_v25 = vpop.f32.mrf.mxu0  ;;  %v1587_v21 = vpop.f32.mrf.mxu1 }
 0x124   : > { %v5705_v44 = vadd.f32 %v4292_v25, %v1677_v42  ;;  %v1678_v18 = vadd.f32 %v1587_v21, %v5646_v38 }
 0x125   : > { %v1884_v56 = vpop.f32.mrf.mxu0  ;;  %v4262_v19 = vpop.f32.mrf.mxu1 }
 0x126   : > { %v5708_v5 = vadd.f32 %v1884_v56, %v1675_v15  ;;  %v1681_v45 = vadd.f32 %v4262_v19, %v5650_v51 }
 0x127   : > { %v4295_v13 = vpop.f32.mrf.mxu0  ;;  %4498 = vmatmul.mubr.msk.bf16.gmra.mxu0 %vm1142_vm1, %v5331_v50  ;;  %v1590_v2 = vpop.f32.mrf.mxu1 }
 0x128   : > { %v5713_v17 = vadd.f32 %v4295_v13, %v1680_v35  ;;  %4501 = vmatprep.mubr.msk.bf16.mxu0 %vm1142_vm1, %v5346_v26  ;;  %v1679_v41 = vadd.f32 %v1590_v2, %v5654_v31 }
 0x129   : > { %v1897_v61 = vpop.f32.mrf.mxu0  ;;  %v4265_v60 = vpop.f32.mrf.mxu1  ;;  %4468 = vmatmul.mubr.msk.bf16.gmra.mxu1 %vm1142_vm1, %v4878_v46 }
 0x12a   : > { %v5718_v38 = vadd.f32 %v1897_v61, %v1678_v18  ;;  %v1684_v51 = vadd.f32 %v4265_v60, %v5564_v48  ;;  %4471 = vmatprep.mubr.msk.bf16.mxu1 %vm1142_vm1, %v4965_v33 }
 0x12b   : > { %v4296_v29 = vpop.f32.mrf.mxu0  ;;  %v1603_v27 = vpop.f32.mrf.mxu1 }
 0x12c   : > { %v5725_v50 = vadd.f32 %v4296_v29, %v1681_v45  ;;  %v1682_v26 = vadd.f32 %v1603_v27, %v5566_v8  ;;  %v6310_v27 = vmov 0.0|0.0  }
 0x12d   : > { %v1900_v11 = vpop.f32.mrf.mxu0  ;;  %v4266_v53 = vpop.f32.mrf.mxu1 }
 0x12e   : > { %v5728_v31 = vadd.f32 %v1900_v11, %v1679_v41  ;;  %v1685_v34 = vadd.f32 %v4266_v53, %v5572_v57 }
 0x12f   : > { %v4299_v42 = vpop.f32.mrf.mxu0  ;;  %4502 = vmatmul.mubr.msk.bf16.gmra.mxu0 %vm1142_vm1, %v5357_v39  ;;  %v1606_v48 = vpop.f32.mrf.mxu1 }
 0x130   : > { %v5733_v46 = vadd.f32 %v4299_v42, %v1684_v51  ;;  %4505 = vmatprep.mubr.msk.bf16.mxu0 %vm1142_vm1, %v5378_v12  ;;  %v1683_v33 = vadd.f32 %v1606_v48, %v5576_v47 }
 0x131   : > { %v1913_v24 = vpop.f32.mrf.mxu0  ;;  %v4269_v20 = vpop.f32.mrf.mxu1  ;;  %4472 = vmatmul.mubr.msk.bf16.gmra.mxu1 %vm1142_vm1, %v4983_v43 }
 0x132   : > { %v5738_v8 = vadd.f32 %v1913_v24, %v1682_v26  ;;  %v1688_v57 = vadd.f32 %v4269_v20, %v5580_v3  ;;  %4475 = vmatprep.mubr.msk.bf16.mxu1 %vm1142_vm1, %v5044_v28  ;;  %v6311_v26 = vld [vmem:[#allocation6_spill] sm:$0xff]  ;;  %v6313_v24 = vld [vmem:[#allocation8_spill] sm:$0xff] }
 0x133   : > { %v4300_v15 = vpop.f32.mrf.mxu0  ;;  %v1619_v62 = vpop.f32.mrf.mxu1 }
 0x134   : > { %v5745_v39 = vadd.f32 %v4300_v15, %v1685_v34  ;;  %v1686_v12 = vadd.f32 %v1619_v62, %v5582_v23  ;;  %v6312_v34 = vld [vmem:[#allocation7_spill] sm:$0xff] }
 0x135   : > { %v1916_v0 = vpop.f32.mrf.mxu0  ;;  %v4270_v35 = vpop.f32.mrf.mxu1 }
 0x136   : > { %v5748_v47 = vadd.f32 %v1916_v0, %v1683_v33  ;;  %v1689_v25 = vadd.f32 %v4270_v35, %v5588_v52 }
 0x137   : > { %v4303_v21 = vpop.f32.mrf.mxu0  ;;  %4506 = vmatmul.mubr.msk.bf16.gmra.mxu0 %vm1142_vm1, %v5387_v58  ;;  %v1622_v3 = vpop.f32.mrf.mxu1 }
 0x138   : > { %v5753_v43 = vadd.f32 %v4303_v21, %v1688_v57  ;;  %4509 = vmatprep.mubr.msk.bf16.mxu0 %vm1142_vm1, %v5407_v6  ;;  %v1687_v28 = vadd.f32 %v1622_v3, %v5592_v54 }
 0x139   : > { %v1929_v18 = vpop.f32.mrf.mxu0  ;;  %v4273_v56 = vpop.f32.mrf.mxu1  ;;  %4476 = vmatmul.mubr.msk.bf16.gmra.mxu1 %vm1142_vm1, %v5071_v63 }
 0x13a   : > { %v5758_v23 = vadd.f32 %v1929_v18, %v1686_v12  ;;  %v1692_v52 = vadd.f32 %v4273_v56, %v5597_v49  ;;  %4479 = vmatprep.mubr.msk.bf16.mxu1 %vm1142_vm1, %v5370_v30  ;;  %v6309_v30 = vld [vmem:[#allocation5_spill] sm:$0xff] }
 0x13b   : > { %v4304_v19 = vpop.f32.mrf.mxu0  ;;  %v1635_v45 = vpop.f32.mrf.mxu1  ;;  %v6314_v12 = vld [vmem:[#allocation9_spill] sm:$0xff] }
 0x13c   : > { %v5765_v58 = vadd.f32 %v4304_v19, %v1689_v25  ;;  %v1690_v6 = vadd.f32 %v1635_v45, %v5603_v36 }
 0x13d   : > { %v1932_v13 = vpop.f32.mrf.mxu0  ;;  %v4274_v2 = vpop.f32.mrf.mxu1 }
 0x13e   : > { %v5768_v54 = vadd.f32 %v1932_v13, %v1687_v28  ;;  %v1693_v41 = vadd.f32 %v4274_v2, %v5609_v1 }
 0x13f   : > { %v4307_v61 = vpop.f32.mrf.mxu0  ;;  %4510 = vmatmul.mubr.msk.bf16.gmra.mxu0 %vm1142_vm1, %v5413_v9  ;;  %v1638_v49 = vpop.f32.mrf.mxu1 }
 0x140   : > { %v5773_v63 = vadd.f32 %v4307_v61, %v1692_v52  ;;  %4513 = vmatprep.mubr.msk.bf16.mxu0 %vm1142_vm1, %v5452_v32  ;;  %v1691_v60 = vadd.f32 %v1638_v49, %v6309_v30 }
 0x141   : > { %v1945_v51 = vpop.f32.mrf.mxu0  ;;  %v4277_v29 = vpop.f32.mrf.mxu1  ;;  %4480 = vmatmul.mubr.bf16.gmra.mxu1 %v6310_v27 }
 0x142   : > { %v5778_v36 = vadd.f32 %v1945_v51, %v1690_v6  ;;  %v1696_v1 = vadd.f32 %v4277_v29, %v6311_v26 }
 0x143   : > { %v4308_v11 = vpop.f32.mrf.mxu0  ;;  %v1651_v9 = vpop.f32.mrf.mxu1 }
 0x144   : > { %v5782_v53 = vadd.f32 %v4308_v11, %v1693_v41  ;;  %v1694_v42 = vadd.f32 %v1651_v9, %v6312_v34 }
 0x145   : > { %v1948_v48 = vpop.f32.mrf.mxu0  ;;  %v4278_v32 = vpop.f32.mrf.mxu1 }
 0x146   : > { %v5785_v33 = vadd.f32 %v1948_v48, %v1691_v60  ;;  %v1697_v20 = vadd.f32 %v4278_v32, %v6313_v24 }
 0x147   : > { %v4311_v57 = vpop.f32.mrf.mxu0  ;;  %4514 = vmatmul.mubr.bf16.gmra.mxu0 %v6310_v27  ;;  %v1654_v62 = vpop.f32.mrf.mxu1 }
 0x148   : > { %v5789_v15 = vadd.f32 %v4311_v57, %v1696_v1  ;;  %v1695_v0 = vadd.f32 %v1654_v62, %v6314_v12 }
 0x149   : > { %v1961_v35 = vpop.f32.mrf.mxu0  ;;  %v4317_v21 = vpop.f32.mrf.mxu1 }
 0x14a   : > { %v5792_v25 = vadd.f32 %v1961_v35, %v1694_v42  ;;  %v2243_v28 = vadd.f32 %v4317_v21, %v5658_v16 }
 0x14b   : > { %v4312_v3 = vpop.f32.mrf.mxu0  ;;  %v2114_v56 = vpop.f32.mrf.mxu1 }
 0x14c   : > { %v5795_v18 = vadd.f32 %v4312_v3, %v1697_v20  ;;  %v2241_v19 = vadd.f32 %v2114_v56, %v5662_v4 }
 0x14d   : > { %v1964_v52 = vpop.f32.mrf.mxu0  ;;  %v4318_v6 = vpop.f32.mrf.mxu1 }
 0x14e   : > { %v5798_v45 = vadd.f32 %v1964_v52, %v1695_v0  ;;  %v2244_v13 = vadd.f32 %v4318_v6, %v5668_v55 }
 0x14f   : > { %v4351_v2 = vpop.f32.mrf.mxu0  ;;  %v2117_v61 = vpop.f32.mrf.mxu1 }
 0x150   : > { %v5801_v41 = vadd.f32 %v4351_v2, %v2243_v28  ;;  %v2242_v49 = vadd.f32 %v2117_v61, %v5670_v22 }
 0x151   : > { %v2379_v30 = vpop.f32.mrf.mxu0  ;;  %v4321_v16 = vpop.f32.mrf.mxu1 }
 0x152   : > { %v5804_v60 = vadd.f32 %v2379_v30, %v2241_v19  ;;  %v2247_v51 = vadd.f32 %v4321_v16, %v5674_v40 }
 0x153   : > { %v4352_v29 = vpop.f32.mrf.mxu0  ;;  %v2130_v4 = vpop.f32.mrf.mxu1 }
 0x154   : > { %v5807_v27 = vadd.f32 %v4352_v29, %v2244_v13  ;;  %v2245_v26 = vadd.f32 %v2130_v4, %v5679_v7 }
 0x155   : > { %v2382_v1 = vpop.f32.mrf.mxu0  ;;  %v4322_v11 = vpop.f32.mrf.mxu1 }
 0x156   : > { %v5810_v55 = vadd.f32 %v2382_v1, %v2242_v49  ;;  %v2248_v9 = vadd.f32 %v4322_v11, %v5685_v10 }
 0x157   : > { %v4355_v34 = vpop.f32.mrf.mxu0  ;;  %v2133_v42 = vpop.f32.mrf.mxu1 }
 0x158   : > { %v5813_v22 = vadd.f32 %v4355_v34, %v2247_v51  ;;  %v2246_v48 = vadd.f32 %v2133_v42, %v5688_v59 }
 0x159   : > { %v2395_v32 = vpop.f32.mrf.mxu0  ;;  %v4325_v24 = vpop.f32.mrf.mxu1 }
 0x15a   : > { %v5816_v40 = vadd.f32 %v2395_v32, %v2245_v26  ;;  %v2251_v20 = vadd.f32 %v4325_v24, %v5693_v14 }
 0x15b   : > { %v4356_v57 = vpop.f32.mrf.mxu0  ;;  %v2146_v62 = vpop.f32.mrf.mxu1 }
 0x15c   : > { %v5819_v7 = vadd.f32 %v4356_v57, %v2248_v9  ;;  %v2249_v12 = vadd.f32 %v2146_v62, %v5698_v37 }
 0x15d   : > { %v2398_v0 = vpop.f32.mrf.mxu0  ;;  %v4326_v35 = vpop.f32.mrf.mxu1 }
 0x15e   : > { %v5822_v10 = vadd.f32 %v2398_v0, %v2246_v48  ;;  %v2252_v21 = vadd.f32 %v4326_v35, %v5705_v44 }
 0x15f   : > { %v4359_v3 = vpop.f32.mrf.mxu0  ;;  %v2149_v28 = vpop.f32.mrf.mxu1 }
 0x160   : > { %v5825_v59 = vadd.f32 %v4359_v3, %v2251_v20  ;;  %v2250_v56 = vadd.f32 %v2149_v28, %v5708_v5 }
 0x161   : > { %v2411_v52 = vpop.f32.mrf.mxu0  ;;  %v4329_v19 = vpop.f32.mrf.mxu1 }
 0x162   : > { %v5828_v14 = vadd.f32 %v2411_v52, %v2249_v12  ;;  %v2255_v6 = vadd.f32 %v4329_v19, %v5713_v17 }
 0x163   : > { %v4360_v13 = vpop.f32.mrf.mxu0  ;;  %v2162_v2 = vpop.f32.mrf.mxu1 }
 0x164   : > { %v5831_v37 = vadd.f32 %v4360_v13, %v2252_v21  ;;  %v2253_v61 = vadd.f32 %v2162_v2, %v5718_v38 }
 0x165   : > { %v2414_v49 = vpop.f32.mrf.mxu0  ;;  %v4330_v30 = vpop.f32.mrf.mxu1 }
 0x166   : > { %v5834_v44 = vadd.f32 %v2414_v49, %v2250_v56  ;;  %v2256_v16 = vadd.f32 %v4330_v30, %v5725_v50 }
 0x167   : > { %v4363_v51 = vpop.f32.mrf.mxu0  ;;  %v2165_v29 = vpop.f32.mrf.mxu1 }
 0x168   : > { %v5837_v5 = vadd.f32 %v4363_v51, %v2255_v6  ;;  %v2254_v4 = vadd.f32 %v2165_v29, %v5728_v31 }
 0x169   : > { %v2427_v26 = vpop.f32.mrf.mxu0  ;;  %v4333_v1 = vpop.f32.mrf.mxu1 }
 0x16a   : > { %v5840_v17 = vadd.f32 %v2427_v26, %v2253_v61  ;;  %v2259_v11 = vadd.f32 %v4333_v1, %v5733_v46 }
 0x16b   : > { %v4364_v9 = vpop.f32.mrf.mxu0  ;;  %v2178_v34 = vpop.f32.mrf.mxu1 }
 0x16c   : > { %v5843_v38 = vadd.f32 %v4364_v9, %v2256_v16  ;;  %v2257_v42 = vadd.f32 %v2178_v34, %v5738_v8 }
 0x16d   : > { %v2430_v48 = vpop.f32.mrf.mxu0  ;;  %v4334_v32 = vpop.f32.mrf.mxu1 }
 0x16e   : > { %v5846_v50 = vadd.f32 %v2430_v48, %v2254_v4  ;;  %v2260_v24 = vadd.f32 %v4334_v32, %v5745_v39 }
 0x16f   : > { %v4367_v20 = vpop.f32.mrf.mxu0  ;;  %v2181_v57 = vpop.f32.mrf.mxu1 }
 0x170   : > { %v5849_v31 = vadd.f32 %v4367_v20, %v2259_v11  ;;  %v2258_v62 = vadd.f32 %v2181_v57, %v5748_v47 }
 0x171   : > { %v2443_v12 = vpop.f32.mrf.mxu0  ;;  %v4337_v0 = vpop.f32.mrf.mxu1 }
 0x172   : > { %v5852_v46 = vadd.f32 %v2443_v12, %v2257_v42  ;;  %v2263_v35 = vadd.f32 %v4337_v0, %v5753_v43 }
 0x173   : > { %v4368_v21 = vpop.f32.mrf.mxu0  ;;  %v2194_v3 = vpop.f32.mrf.mxu1 }
 0x174   : > { %v5855_v8 = vadd.f32 %v4368_v21, %v2260_v24  ;;  %v2261_v28 = vadd.f32 %v2194_v3, %v5758_v23 }
 0x175   : > { %v2446_v56 = vpop.f32.mrf.mxu0  ;;  %v4338_v52 = vpop.f32.mrf.mxu1 }
 0x176   : > { %v5858_v39 = vadd.f32 %v2446_v56, %v2258_v62  ;;  %v2264_v19 = vadd.f32 %v4338_v52, %v5765_v58 }
 0x177   : > { %v4371_v6 = vpop.f32.mrf.mxu0  ;;  %v2197_v13 = vpop.f32.mrf.mxu1 }
 0x178   : > { %6315 = vst [vmem:[#allocation5_spill] sm:$0xff] %v5858_v39  ;;  %v5861_v47 = vadd.f32 %v4371_v6, %v2263_v35  ;;  %v2262_v2 = vadd.f32 %v2197_v13, %v5768_v54 }
 0x179   : > { %v2459_v61 = vpop.f32.mrf.mxu0  ;;  %v4341_v49 = vpop.f32.mrf.mxu1 }
 0x17a   : > { %6316 = vst [vmem:[#allocation6_spill] sm:$0xff] %v5861_v47  ;;  %v5864_v43 = vadd.f32 %v2459_v61, %v2261_v28  ;;  %v2267_v30 = vadd.f32 %v4341_v49, %v5773_v63 }
 0x17b   : > { %v4372_v16 = vpop.f32.mrf.mxu0  ;;  %v2210_v51 = vpop.f32.mrf.mxu1 }
 0x17c   : > { %6317 = vst [vmem:[#allocation7_spill] sm:$0xff] %v5864_v43  ;;  %v5867_v23 = vadd.f32 %v4372_v16, %v2264_v19  ;;  %v2265_v29 = vadd.f32 %v2210_v51, %v5778_v36 }
 0x17d   : > { %v2462_v4 = vpop.f32.mrf.mxu0  ;;  %v4342_v26 = vpop.f32.mrf.mxu1 }
 0x17e   : > { %6318 = vst [vmem:[#allocation8_spill] sm:$0xff] %v5867_v23  ;;  %v5870_v58 = vadd.f32 %v2462_v4, %v2262_v2  ;;  %v2268_v1 = vadd.f32 %v4342_v26, %v5782_v53 }
 0x17f   : > { %v4375_v11 = vpop.f32.mrf.mxu0  ;;  %v2213_v9 = vpop.f32.mrf.mxu1 }
 0x180   : > { %6319 = vst [vmem:[#allocation9_spill] sm:$0xff] %v5870_v58  ;;  %v5873_v54 = vadd.f32 %v4375_v11, %v2267_v30  ;;  %v2266_v34 = vadd.f32 %v2213_v9, %v5785_v33 }
 0x181   : > { %v2475_v42 = vpop.f32.mrf.mxu0  ;;  %v4345_v48 = vpop.f32.mrf.mxu1 }
 0x182   : > { %6320 = vst [vmem:[#allocation10_spill] sm:$0xff] %v5873_v54  ;;  %v5876_v63 = vadd.f32 %v2475_v42, %v2265_v29  ;;  %v2271_v32 = vadd.f32 %v4345_v48, %v5789_v15 }
 0x183   : > { %v4376_v24 = vpop.f32.mrf.mxu0  ;;  %v2226_v20 = vpop.f32.mrf.mxu1 }
 0x184   : > { %6321 = vst [vmem:[#allocation11_spill] sm:$0xff] %v5876_v63  ;;  %v5879_v36 = vadd.f32 %v4376_v24, %v2268_v1  ;;  %v2269_v57 = vadd.f32 %v2226_v20, %v5792_v25 }
 0x185   : > { %v2478_v62 = vpop.f32.mrf.mxu0  ;;  %v4346_v12 = vpop.f32.mrf.mxu1 }
 0x186   : > { %6322 = vst [vmem:[#allocation12_spill] sm:$0xff] %v5879_v36  ;;  %v5882_v53 = vadd.f32 %v2478_v62, %v2266_v34  ;;  %v2272_v0 = vadd.f32 %v4346_v12, %v5795_v18 }
 0x187   : > { %v4379_v35 = vpop.f32.mrf.mxu0  ;;  %v2229_v21 = vpop.f32.mrf.mxu1 }
 0x188   : > { %6323 = vst [vmem:[#allocation13_spill] sm:$0xff] %v5882_v53  ;;  %v5885_v33 = vadd.f32 %v4379_v35, %v2271_v32  ;;  %v2270_v3 = vadd.f32 %v2229_v21, %v5798_v45 }
 0x189   : > { %v2491_v28 = vpop.f32.mrf.mxu0  ;;  %v4385_v56 = vpop.f32.mrf.mxu1 }
 0x18a   : > { %6324 = vst [vmem:[#allocation14_spill] sm:$0xff] %v5885_v33  ;;  %v5888_v15 = vadd.f32 %v2491_v28, %v2269_v57 }
 0x18b   : > { %v4380_v52 = vpop.f32.mrf.mxu0  ;;  %v2644_v25 = vpop.f32.mrf.mxu1 }
 0x18c   : > { %6325 = vst [vmem:[#allocation15_spill] sm:$0xff] %v5888_v15  ;;  %v5890_v19 = vadd.f32 %v4380_v52, %v2272_v0 }
 0x18d   : > { %v2494_v6 = vpop.f32.mrf.mxu0  ;;  %v4386_v2 = vpop.f32.mrf.mxu1 }
 0x18e   : > { %6326 = vst [vmem:[#allocation16_spill] sm:$0xff] %v5890_v19  ;;  %v5892_v13 = vadd.f32 %v2494_v6, %v2270_v3 }
 0x18f   : > { %v4419_v61 = vpop.f32.mrf.mxu0  ;;  %v5894_v18 = vpop.f32.mrf.mxu1 }
 0x190   : > { %6327 = vst [vmem:[#allocation17_spill] sm:$0xff] %v5892_v13 }
 0x191   : > { %v5896_v49 = vpop.f32.mrf.mxu0  ;;  %v5898_v30 = vpop.f32.mrf.mxu1 }
 0x193   : > { %v5900_v45 = vpop.f32.mrf.mxu0  ;;  %v5902_v16 = vpop.f32.mrf.mxu1 }
 0x195   : > { %v5904_v51 = vpop.f32.mrf.mxu0  ;;  %v5906_v29 = vpop.f32.mrf.mxu1 }
 0x197   : > { %v5908_v4 = vpop.f32.mrf.mxu0  ;;  %v5910_v26 = vpop.f32.mrf.mxu1 }
 0x199   : > { %v5912_v1 = vpop.f32.mrf.mxu0  ;;  %v5914_v11 = vpop.f32.mrf.mxu1 }
 0x19b   : > { %v5916_v9 = vpop.f32.mrf.mxu0  ;;  %v5918_v34 = vpop.f32.mrf.mxu1 }
 0x19d   : > { %v5920_v42 = vpop.f32.mrf.mxu0  ;;  %v5922_v48 = vpop.f32.mrf.mxu1 }
 0x19f   : > { %v5924_v32 = vpop.f32.mrf.mxu0  ;;  %v5926_v24 = vpop.f32.mrf.mxu1 }
 0x1a1   : > { %v5928_v20 = vpop.f32.mrf.mxu0  ;;  %v5930_v57 = vpop.f32.mrf.mxu1 }
 0x1a3   : > { %v5932_v62 = vpop.f32.mrf.mxu0  ;;  %v5934_v12 = vpop.f32.mrf.mxu1 }
 0x1a5   : > { %v5936_v0 = vpop.f32.mrf.mxu0  ;;  %v5938_v35 = vpop.f32.mrf.mxu1 }
 0x1a7   : > { %v5940_v21 = vpop.f32.mrf.mxu0  ;;  %v5942_v3 = vpop.f32.mrf.mxu1 }
 0x1a9   : > { %v5944_v28 = vpop.f32.mrf.mxu0  ;;  %v5946_v52 = vpop.f32.mrf.mxu1 }
 0x1ab   : > { %v5948_v6 = vpop.f32.mrf.mxu0  ;;  %v5950_v13 = vpop.f32.mrf.mxu1 }
 0x1ad   : > { %v5952_v19 = vpop.f32.mrf.mxu0  ;;  %v5954_v15 = vpop.f32.mrf.mxu1 }
 0x1ae   : > { %6328 = vst [vmem:[#allocation18_spill] sm:$0xff] %v5954_v15 }
 0x1af   : > { %v5956_v33 = vpop.f32.mrf.mxu0  ;;  %v5958_v53 = vpop.f32.mrf.mxu1 }
 0x1b0   : > { %6329 = vst [vmem:[#allocation19_spill] sm:$0xff] %v5956_v33  ;;  %6330 = vst [vmem:[#allocation20_spill] sm:$0xff] %v5958_v53 }
 0x1b1   : > { %v5960_v36 = vpop.f32.mrf.mxu0  ;;  %v5962_v63 = vpop.f32.mrf.mxu1 }
 0x1b2   : > { %6331 = vst [vmem:[#allocation21_spill] sm:$0xff] %v5960_v36  ;;  %6332 = vst [vmem:[#allocation22_spill] sm:$0xff] %v5962_v63 }
 0x1b3   : > { %v5964_v54 = vpop.f32.mrf.mxu0  ;;  %v5966_v58 = vpop.f32.mrf.mxu1 }
 0x1b4   : > { %6333 = vst [vmem:[#allocation23_spill] sm:$0xff] %v5964_v54  ;;  %6334 = vst [vmem:[#allocation24_spill] sm:$0xff] %v5966_v58 }
 0x1b5   : > { %v5968_v23 = vpop.f32.mrf.mxu0  ;;  %v5970_v43 = vpop.f32.mrf.mxu1 }
 0x1b6   : > { %6335 = vst [vmem:[#allocation25_spill] sm:$0xff] %v5968_v23  ;;  %6336 = vst [vmem:[#allocation26_spill] sm:$0xff] %v5970_v43 }
 0x1b7   : > { %v5972_v47 = vpop.f32.mrf.mxu0  ;;  %v5974_v39 = vpop.f32.mrf.mxu1 }
 0x1b8   : > { %6337 = vst [vmem:[#allocation27_spill] sm:$0xff] %v5972_v47  ;;  %6338 = vst [vmem:[#allocation28_spill] sm:$0xff] %v5974_v39 }
 0x1b9   : > { %v5976_v15 = vpop.f32.mrf.mxu0  ;;  %v5978_v33 = vpop.f32.mrf.mxu1 }
 0x1ba   : > { %6339 = vst [vmem:[#allocation29_spill] sm:$0xff] %v5976_v15  ;;  %6340 = vst [vmem:[#allocation30_spill] sm:$0xff] %v5978_v33 }
 0x1bb   : > { %v5980_v53 = vpop.f32.mrf.mxu0  ;;  %v5982_v36 = vpop.f32.mrf.mxu1 }
 0x1bc   : > { %6341 = vst [vmem:[#allocation31_spill] sm:$0xff] %v5980_v53  ;;  %6342 = vst [vmem:[#allocation32_spill] sm:$0xff] %v5982_v36  ;;  %v2773_v36 = vadd.f32 %v4385_v56, %v5801_v41  ;;  %v2772_v41 = vadd.f32 %v5894_v18, %v5810_v55  ;;  %v6029_v55 = vld [vmem:[%s6238_s2] ss:$0 sm:$0xff] }
 0x1bd   : > { %v5984_v63 = vpop.f32.mrf.mxu0  ;;  %v5986_v54 = vpop.f32.mrf.mxu1 }
 0x1be   : > { %6343 = vst [vmem:[#allocation33_spill] sm:$0xff] %v5984_v63  ;;  %6344 = vst [vmem:[#allocation34_spill] sm:$0xff] %v5986_v54 }
 0x1bf   : > { %v5988_v58 = vpop.f32.mrf.mxu0  ;;  %v5990_v23 = vpop.f32.mrf.mxu1 }
 0x1c0   : > { %6345 = vst [vmem:[#allocation35_spill] sm:$0xff] %v5988_v58  ;;  %6346 = vst [vmem:[#allocation36_spill] sm:$0xff] %v5990_v23  ;;  %v2771_v58 = vadd.f32 %v2644_v25, %v5804_v60  ;;  %v2777_v25 = vadd.f32 %v5898_v30, %v5813_v22 }
 0x1c1   : > { %v5992_v43 = vpop.f32.mrf.mxu0  ;;  %v5994_v47 = vpop.f32.mrf.mxu1 }
 0x1c2   : > { %6347 = vst [vmem:[#allocation37_spill] sm:$0xff] %v5992_v43  ;;  %6348 = vst [vmem:[#allocation38_spill] sm:$0xff] %v5994_v47  ;;  %v2774_v47 = vadd.f32 %v4386_v2, %v5807_v27  ;;  %v3036_v56 = vadd.f32 %v5896_v49, %v2771_v58  ;;  %v3042_v18 = vadd.f32 %v5908_v4, %v2777_v25 }
 0x1c3   : > { %v5996_v39 = vpop.f32.mrf.mxu0  ;;  %v5998_v15 = vpop.f32.mrf.mxu1 }
 0x1c4   : > { %6349 = vst [vmem:[#allocation39_spill] sm:$0xff] %v5996_v39  ;;  %6350 = vst [vmem:[#allocation40_spill] sm:$0xff] %v5998_v15  ;;  %v3038_v39 = vadd.f32 %v4419_v61, %v2773_v36  ;;  %v3039_v27 = vadd.f32 %v5900_v45, %v2774_v47  ;;  %v2775_v61 = vadd.f32 %v5902_v16, %v5816_v40 }
 0x1c5   : > { %v6000_v53 = vpop.f32.mrf.mxu0  ;;  %v6003_v63 = vpop.f32.mrf.mxu1  ;;  %v2778_v47 = vadd.f32 %v5906_v29, %v5819_v7  ;;  %v2776_v16 = vadd.f32 %v5910_v26, %v5822_v10  ;;  %v2781_v29 = vadd.f32 %v5914_v11, %v5825_v59 }
 0x1c6   : > { %6351 = vst [vmem:[#allocation41_spill] sm:$0xff] %v6003_v63 }
 0x1c7   : > { %v6005_v54 = vpop.f32.mrf.mxu0  ;;  %v6008_v23 = vpop.f32.mrf.mxu1  ;;  %v3043_v4 = vadd.f32 %v5916_v9, %v2778_v47  ;;  %v3041_v59 = vadd.f32 %v5920_v42, %v2776_v16  ;;  %v2782_v47 = vadd.f32 %v5922_v48, %v5831_v37 }
 0x1c8   : > { %6352 = vst [vmem:[#allocation42_spill] sm:$0xff] %v6005_v54 }
 0x1c9   : > { %v6010_v43 = vpop.f32.mrf.mxu0  ;;  %v4453_v15 = vpop.f32.mrf.mxu1 }
 0x1ca   : > { %v3300_v63 = vadd.f32 %v4453_v15, %v3038_v39  ;;  %v3037_v39 = vadd.f32 %v5904_v51, %v2772_v41 }
 0x1cb   : > { %v6013_v33 = vpop.f32.mrf.mxu0  ;;  %v3171_v54 = vpop.f32.mrf.mxu1 }
 0x1cc   : > { %6353 = vst [vmem:[#allocation43_spill] sm:$0xff] %v6013_v33  ;;  %v3298_v36 = vadd.f32 %v3171_v54, %v3036_v56  ;;  %v3040_v56 = vadd.f32 %v5912_v1, %v2775_v61  ;;  %v2779_v61 = vadd.f32 %v5918_v34, %v5828_v14 }
 0x1cd   : > { %v6019_v60 = vpop.f32.mrf.mxu0  ;;  %v4454_v2 = vpop.f32.mrf.mxu1 }
 0x1ce   : > { %v3301_v58 = vadd.f32 %v4454_v2, %v3039_v27 }
 0x1cf   : > { %v4487_v33 = vpop.f32.mrf.mxu0  ;;  %v3174_v22 = vpop.f32.mrf.mxu1 }
 0x1d0   : > { %v3565_v15 = vadd.f32 %v4487_v33, %v3300_v63  ;;  %v3299_v49 = vadd.f32 %v3174_v22, %v3037_v39 }
 0x1d1   : > { %v3436_v54 = vpop.f32.mrf.mxu0  ;;  %v4457_v45 = vpop.f32.mrf.mxu1 }
 0x1d2   : > { %v3668_v40 = vadd.f32 %v6029_v55, %v3565_v15  ;;  %v3563_v30 = vadd.f32 %v3436_v54, %v3298_v36  ;;  %v3304_v33 = vadd.f32 %v4457_v45, %v3042_v18  ;;  %v3046_v54 = vadd.f32 %v5924_v32, %v2781_v29 }
 0x1d3   : > { %v4488_v51 = vpop.f32.mrf.mxu0  ;;  %v3187_v7 = vpop.f32.mrf.mxu1  ;;  %v3044_v45 = vadd.f32 %v5928_v20, %v2779_v61  ;;  %v2783_v29 = vadd.f32 %v5934_v12, %v5840_v17 }
 0x1d4   : > { %v3700_v41 = vmax.f32 %v3668_v40, 0.0  ;;  %v3666_v63 = vadd.f32 %v6029_v55, %v3563_v30  ;;  %v3566_v27 = vadd.f32 %v4488_v51, %v3301_v58  ;;  %v3302_v1 = vadd.f32 %v3187_v7, %v3040_v56 }
 0x1d5   : > { %v3439_v25 = vpop.f32.mrf.mxu0  ;;  %v4458_v2 = vpop.f32.mrf.mxu1  ;;  %v2780_v30 = vadd.f32 %v5926_v24, %v5834_v44 }
 0x1d6   : > { %3732 = vst [vmem:[%s6045_s9 + $0x10] sm:$0xff] %v3700_v41  ;;  %v3698_v10 = vmax.f32 %v3666_v63, 0.0  ;;  %v3669_v26 = vadd.f32 %v6029_v55, %v3566_v27  ;;  %v3564_v36 = vadd.f32 %v3439_v25, %v3299_v49  ;;  %v3305_v58 = vadd.f32 %v4458_v2, %v3043_v4 }
 0x1d7   : > { %v4491_v11 = vpop.f32.mrf.mxu0  ;;  %v3190_v22 = vpop.f32.mrf.mxu1  ;;  %v2785_v41 = vadd.f32 %v5930_v57, %v5837_v5  ;;  %v3047_v63 = vadd.f32 %v5932_v62, %v2782_v47  ;;  %v3045_v4 = vadd.f32 %v5936_v0, %v2780_v30 }
 0x1d8   : > { %3730 = vst [vmem:[%s6045_s9] sm:$0xff] %v3698_v10  ;;  %v3701_v9 = vmax.f32 %v3669_v26, 0.0  ;;  %v3667_v39 = vadd.f32 %v6029_v55, %v3564_v36  ;;  %v3569_v15 = vadd.f32 %v4491_v11, %v3304_v33  ;;  %v3303_v34 = vadd.f32 %v3190_v22, %v3041_v59 }
 0x1d9   : > { %v3452_v18 = vpop.f32.mrf.mxu0  ;;  %v4461_v49 = vpop.f32.mrf.mxu1  ;;  %v3050_v36 = vadd.f32 %v5940_v21, %v2785_v41  ;;  %v2784_v11 = vadd.f32 %v5942_v3, %v5846_v50  ;;  %v2789_v22 = vadd.f32 %v5946_v52, %v5849_v31  ;;  %v6356_v41 = vld [vmem:[#allocation5_spill] sm:$0xff] }
 0x1da   : > { %3733 = vst [vmem:[%s6045_s9 + $0x18] sm:$0xff] %v3701_v9  ;;  %v3699_v40 = vmax.f32 %v3667_v39, 0.0  ;;  %v3672_v14 = vadd.f32 %v6029_v55, %v3569_v15  ;;  %v3567_v42 = vadd.f32 %v3452_v18, %v3302_v1  ;;  %v3308_v48 = vadd.f32 %v4461_v49, %v3046_v54 }
 0x1db   : > { %v4492_v16 = vpop.f32.mrf.mxu0  ;;  %v3203_v51 = vpop.f32.mrf.mxu1  ;;  %v2786_v1 = vadd.f32 %v5938_v35, %v5843_v38  ;;  %v3048_v9 = vadd.f32 %v5944_v28, %v2783_v29 }
 0x1dc   : > { %3731 = vst [vmem:[%s6045_s9 + $0x8] sm:$0xff] %v3699_v40  ;;  %v3704_v56 = vmax.f32 %v3672_v14, 0.0  ;;  %v3670_v37 = vadd.f32 %v6029_v55, %v3567_v42  ;;  %v3570_v32 = vadd.f32 %v4492_v16, %v3305_v58  ;;  %v3306_v24 = vadd.f32 %v3203_v51, %v3044_v45  ;;  %v6354_v45 = vld [vmem:[#allocation18_spill] sm:$0xff] }
 0x1dd   : > { %v3455_v33 = vpop.f32.mrf.mxu0  ;;  %v4462_v7 = vpop.f32.mrf.mxu1  ;;  %v3051_v47 = vadd.f32 %v5948_v6, %v2786_v1  ;;  %v2787_v14 = vadd.f32 %v5950_v13, %v5852_v46  ;;  %v2790_v16 = vadd.f32 %v6354_v45, %v5855_v8 }
 0x1de   : > { %3736 = vst [vmem:[%s6045_s9 + $0x30] sm:$0xff] %v3704_v56  ;;  %v3702_v27 = vmax.f32 %v3670_v37, 0.0  ;;  %v3673_v44 = vadd.f32 %v6029_v55, %v3570_v32  ;;  %v3568_v20 = vadd.f32 %v3455_v33, %v3303_v34  ;;  %v3309_v57 = vadd.f32 %v4462_v7, %v3047_v63  ;;  %v6355_v56 = vld [vmem:[#allocation19_spill] sm:$0xff]  ;;  %v6357_v63 = vld [vmem:[#allocation20_spill] sm:$0xff] }
 0x1df   : > { %v4495_v25 = vpop.f32.mrf.mxu0  ;;  %v3206_v26 = vpop.f32.mrf.mxu1  ;;  %v3049_v34 = vadd.f32 %v5952_v19, %v2784_v11  ;;  %v3054_v37 = vadd.f32 %v6355_v56, %v2789_v22  ;;  %v2788_v33 = vadd.f32 %v6357_v63, %v6356_v41  ;;  %v6364_v11 = vld [vmem:[#allocation25_spill] sm:$0xff]  ;;  %v6365_v22 = vld [vmem:[#allocation8_spill] sm:$0xff] }
 0x1e0   : > { %3734 = vst [vmem:[%s6045_s9 + $0x20] sm:$0xff] %v3702_v27  ;;  %v3705_v10 = vmax.f32 %v3673_v44, 0.0  ;;  %v3671_v5 = vadd.f32 %v6029_v55, %v3568_v20  ;;  %v3573_v62 = vadd.f32 %v4495_v25, %v3308_v48  ;;  %v3307_v12 = vadd.f32 %v3206_v26, %v3045_v4  ;;  %v6358_v27 = vld [vmem:[#allocation21_spill] sm:$0xff]  ;;  %v6359_v25 = vld [vmem:[#allocation6_spill] sm:$0xff] }
 0x1e1   : > { %v3468_v2 = vpop.f32.mrf.mxu0  ;;  %v4465_v59 = vpop.f32.mrf.mxu1  ;;  %v3052_v44 = vadd.f32 %v6358_v27, %v2787_v14 }
 0x1e2   : > { %3737 = vst [vmem:[%s6045_s9 + $0x38] sm:$0xff] %v3705_v10  ;;  %v3703_v61 = vmax.f32 %v3671_v5, 0.0  ;;  %v3676_v17 = vadd.f32 %v6029_v55, %v3573_v62  ;;  %v3571_v0 = vadd.f32 %v3468_v2, %v3306_v24  ;;  %v3312_v35 = vadd.f32 %v4465_v59, %v3050_v36  ;;  %v6360_v10 = vld [vmem:[#allocation22_spill] sm:$0xff] }
 0x1e3   : > { %v4496_v39 = vpop.f32.mrf.mxu0  ;;  %v3219_v15 = vpop.f32.mrf.mxu1  ;;  %v2793_v5 = vadd.f32 %v6360_v10, %v6359_v25 }
 0x1e4   : > { %3735 = vst [vmem:[%s6045_s9 + $0x28] sm:$0xff] %v3703_v61  ;;  %v3708_v58 = vmax.f32 %v3676_v17, 0.0  ;;  %v3674_v38 = vadd.f32 %v6029_v55, %v3571_v0  ;;  %v3574_v21 = vadd.f32 %v4496_v39, %v3309_v57  ;;  %v3310_v3 = vadd.f32 %v3219_v15, %v3048_v9  ;;  %v6361_v57 = vld [vmem:[#allocation23_spill] sm:$0xff]  ;;  %v6363_v0 = vld [vmem:[#allocation24_spill] sm:$0xff] }
 0x1e5   : > { %v3471_v54 = vpop.f32.mrf.mxu0  ;;  %v4466_v40 = vpop.f32.mrf.mxu1  ;;  %v3055_v62 = vadd.f32 %v6361_v57, %v2790_v16  ;;  %v3053_v9 = vadd.f32 %v6364_v11, %v2788_v33 }
 0x1e6   : > { %3740 = vst [vmem:[%s6045_s9 + $0x50] sm:$0xff] %v3708_v58  ;;  %v3706_v18 = vmax.f32 %v3674_v38, 0.0  ;;  %v3677_v50 = vadd.f32 %v6029_v55, %v3574_v21  ;;  %v3572_v28 = vadd.f32 %v3471_v54, %v3307_v12  ;;  %v3313_v52 = vadd.f32 %v4466_v40, %v3051_v47  ;;  %v6362_v12 = vld [vmem:[#allocation7_spill] sm:$0xff]  ;;  %v6366_v47 = vld [vmem:[#allocation26_spill] sm:$0xff] }
 0x1e7   : > { %v4499_v42 = vpop.f32.mrf.mxu0  ;;  %v3222_v30 = vpop.f32.mrf.mxu1  ;;  %v2791_v59 = vadd.f32 %v6363_v0, %v6362_v12  ;;  %v2794_v54 = vadd.f32 %v6366_v47, %v6365_v22 }
 0x1e8   : > { %3738 = vst [vmem:[%s6045_s9 + $0x40] sm:$0xff] %v3706_v18  ;;  %v3709_v49 = vmax.f32 %v3677_v50, 0.0  ;;  %v3675_v31 = vadd.f32 %v6029_v55, %v3572_v28  ;;  %v3577_v6 = vadd.f32 %v4499_v42, %v3312_v35  ;;  %v3311_v19 = vadd.f32 %v3222_v30, %v3049_v34  ;;  %v6367_v18 = vld [vmem:[#allocation27_spill] sm:$0xff] }
 0x1e9   : > { %v3484_v48 = vpop.f32.mrf.mxu0  ;;  %v4469_v51 = vpop.f32.mrf.mxu1  ;;  %v3058_v50 = vadd.f32 %v6367_v18, %v2793_v5 }
 0x1ea   : > { %3741 = vst [vmem:[%s6045_s9 + $0x58] sm:$0xff] %v3709_v49  ;;  %v3707_v32 = vmax.f32 %v3675_v31, 0.0  ;;  %v3680_v46 = vadd.f32 %v6029_v55, %v3577_v6  ;;  %v3575_v13 = vadd.f32 %v3484_v48, %v3310_v3  ;;  %v3316_v7 = vadd.f32 %v4469_v51, %v3054_v37  ;;  %v6368_v49 = vld [vmem:[#allocation9_spill] sm:$0xff]  ;;  %v6369_v31 = vld [vmem:[#allocation28_spill] sm:$0xff]  ;;  %v6373_v51 = vld [vmem:[#allocation31_spill] sm:$0xff] }
 0x1eb   : > { %v4500_v24 = vpop.f32.mrf.mxu0  ;;  %v3235_v4 = vpop.f32.mrf.mxu1  ;;  %v6370_v6 = vld [vmem:[#allocation29_spill] sm:$0xff]  ;;  %v3059_v41 = vadd.f32 %v6373_v51, %v2794_v54 }
 0x1ec   : > { %3739 = vst [vmem:[%s6045_s9 + $0x48] sm:$0xff] %v3707_v32  ;;  %v3712_v20 = vmax.f32 %v3680_v46, 0.0  ;;  %v3678_v8 = vadd.f32 %v6029_v55, %v3575_v13  ;;  %v3578_v29 = vadd.f32 %v4500_v24, %v3313_v52  ;;  %v3314_v2 = vadd.f32 %v3235_v4, %v3052_v44  ;;  %v6371_v46 = vld [vmem:[#allocation10_spill] sm:$0xff]  ;;  %v6376_v4 = vld [vmem:[#allocation33_spill] sm:$0xff] }
 0x1ed   : > { %v3487_v26 = vpop.f32.mrf.mxu0  ;;  %v4470_v17 = vpop.f32.mrf.mxu1  ;;  %v2792_v52 = vadd.f32 %v6369_v31, %v6368_v49  ;;  %v3056_v30 = vadd.f32 %v6370_v6, %v2791_v59 }
 0x1ee   : > { %3744 = vst [vmem:[%s6045_s9 + $0x70] sm:$0xff] %v3712_v20  ;;  %v3710_v1 = vmax.f32 %v3678_v8, 0.0  ;;  %v3681_v36 = vadd.f32 %v6029_v55, %v3578_v29  ;;  %v3576_v61 = vadd.f32 %v3487_v26, %v3311_v19  ;;  %v3317_v35 = vadd.f32 %v4470_v17, %v3055_v62  ;;  %v6372_v19 = vld [vmem:[#allocation30_spill] sm:$0xff]  ;;  %v6374_v8 = vld [vmem:[#allocation11_spill] sm:$0xff] }
 0x1ef   : > { %v4503_v39 = vpop.f32.mrf.mxu0  ;;  %v3238_v15 = vpop.f32.mrf.mxu1  ;;  %v2797_v13 = vadd.f32 %v6372_v19, %v6371_v46  ;;  %v3057_v25 = vadd.f32 %v6376_v4, %v2792_v52  ;;  %v6379_v17 = vld [vmem:[#allocation35_spill] sm:$0xff] }
 0x1f0   : > { %3742 = vst [vmem:[%s6045_s9 + $0x60] sm:$0xff] %v3710_v1  ;;  %v3713_v58 = vmax.f32 %v3681_v36, 0.0  ;;  %v3679_v38 = vadd.f32 %v6029_v55, %v3576_v61  ;;  %v3581_v21 = vadd.f32 %v4503_v39, %v3316_v7  ;;  %v3315_v14 = vadd.f32 %v3238_v15, %v3053_v9  ;;  %v6375_v7 = vld [vmem:[#allocation32_spill] sm:$0xff]  ;;  %v6382_v15 = vld [vmem:[#allocation37_spill] sm:$0xff] }
 0x1f1   : > { %v3500_v3 = vpop.f32.mrf.mxu0  ;;  %v4473_v42 = vpop.f32.mrf.mxu1  ;;  %v2795_v29 = vadd.f32 %v6375_v7, %v6374_v8  ;;  %v6377_v36 = vld [vmem:[#allocation12_spill] sm:$0xff]  ;;  %v3062_v12 = vadd.f32 %v6379_v17, %v2797_v13  ;;  %v6392_v17 = vld [vmem:[#allocation43_spill] sm:$0xff] }
 0x1f2   : > { %3745 = vst [vmem:[%s6045_s9 + $0x78] sm:$0xff] %v3713_v58  ;;  %v3711_v28 = vmax.f32 %v3679_v38, 0.0  ;;  %v3684_v40 = vadd.f32 %v6029_v55, %v3581_v21  ;;  %v3579_v34 = vadd.f32 %v3500_v3, %v3314_v2  ;;  %v3320_v37 = vadd.f32 %v4473_v42, %v3058_v50  ;;  %v6378_v2 = vld [vmem:[#allocation34_spill] sm:$0xff]  ;;  %v6380_v38 = vld [vmem:[#allocation13_spill] sm:$0xff]  ;;  %v6385_v42 = vld [vmem:[#allocation39_spill] sm:$0xff] }
 0x1f3   : > { %v4504_v45 = vpop.f32.mrf.mxu0  ;;  %v3251_v32 = vpop.f32.mrf.mxu1  ;;  %v2798_v61 = vadd.f32 %v6378_v2, %v6377_v36  ;;  %v3060_v22 = vadd.f32 %v6382_v15, %v2795_v29 }
 0x1f4   : > { %3743 = vst [vmem:[%s6045_s9 + $0x68] sm:$0xff] %v3711_v28  ;;  %v3716_v16 = vmax.f32 %v3684_v40, 0.0  ;;  %v3682_v56 = vadd.f32 %v6029_v55, %v3579_v34  ;;  %v3582_v48 = vadd.f32 %v4504_v45, %v3317_v35  ;;  %v3318_v44 = vadd.f32 %v3251_v32, %v3056_v30  ;;  %v6381_v35 = vld [vmem:[#allocation36_spill] sm:$0xff]  ;;  %v6383_v40 = vld [vmem:[#allocation14_spill] sm:$0xff] }
 0x1f5   : > { %v3503_v63 = vpop.f32.mrf.mxu0  ;;  %v4474_v20 = vpop.f32.mrf.mxu1  ;;  %v2796_v21 = vadd.f32 %v6381_v35, %v6380_v38  ;;  %v3063_v49 = vadd.f32 %v6385_v42, %v2798_v61 }
 0x1f6   : > { %3748 = vst [vmem:[%s6045_s9 + $0x90] sm:$0xff] %v3716_v16  ;;  %v3714_v33 = vmax.f32 %v3682_v56, 0.0  ;;  %v3685_v27 = vadd.f32 %v6029_v55, %v3582_v48  ;;  %v3580_v24 = vadd.f32 %v3503_v63, %v3315_v14  ;;  %v3321_v62 = vadd.f32 %v4474_v20, %v3059_v41  ;;  %v6384_v14 = vld [vmem:[#allocation38_spill] sm:$0xff]  ;;  %v6386_v56 = vld [vmem:[#allocation15_spill] sm:$0xff] }
 0x1f7   : > { %v4507_v10 = vpop.f32.mrf.mxu0  ;;  %v3254_v1 = vpop.f32.mrf.mxu1  ;;  %v2801_v34 = vadd.f32 %v6384_v14, %v6383_v40  ;;  %v3061_v32 = vadd.f32 %v6000_v53, %v2796_v21 }
 0x1f8   : > { %3746 = vst [vmem:[%s6045_s9 + $0x80] sm:$0xff] %v3714_v33  ;;  %v3717_v5 = vmax.f32 %v3685_v27, 0.0  ;;  %v3683_v57 = vadd.f32 %v6029_v55, %v3580_v24  ;;  %v3585_v26 = vadd.f32 %v4507_v10, %v3320_v37  ;;  %v3319_v9 = vadd.f32 %v3254_v1, %v3057_v25  ;;  %v6387_v37 = vld [vmem:[#allocation40_spill] sm:$0xff]  ;;  %v6389_v27 = vld [vmem:[#allocation41_spill] sm:$0xff]  ;;  %v6390_v24 = vld [vmem:[#allocation42_spill] sm:$0xff] }
 0x1f9   : > { %v3516_v0 = vpop.f32.mrf.mxu0  ;;  %v4477_v58 = vpop.f32.mrf.mxu1  ;;  %v2799_v48 = vadd.f32 %v6387_v37, %v6386_v56  ;;  %v6388_v33 = vld [vmem:[#allocation16_spill] sm:$0xff]  ;;  %v3066_v20 = vadd.f32 %v6390_v24, %v2801_v34  ;;  %v6391_v10 = vld [vmem:[#allocation17_spill] sm:$0xff] }
 0x1fa   : > { %3749 = vst [vmem:[%s6045_s9 + $0x98] sm:$0xff] %v3717_v5  ;;  %v3715_v59 = vmax.f32 %v3683_v57, 0.0  ;;  %v3688_v11 = vadd.f32 %v6029_v55, %v3585_v26  ;;  %v3583_v39 = vadd.f32 %v3516_v0, %v3318_v44  ;;  %v3324_v50 = vadd.f32 %v4477_v58, %v3062_v12 }
 0x1fb   : > { %v4508_v47 = vpop.f32.mrf.mxu0  ;;  %v3267_v28 = vpop.f32.mrf.mxu1  ;;  %v2802_v44 = vadd.f32 %v6389_v27, %v6388_v33  ;;  %v2800_v5 = vadd.f32 %v6008_v23, %v6391_v10  ;;  %v3064_v57 = vadd.f32 %v6010_v43, %v2799_v48 }
 0x1fc   : > { %3747 = vst [vmem:[%s6045_s9 + $0x88] sm:$0xff] %v3715_v59  ;;  %v3720_v54 = vmax.f32 %v3688_v11, 0.0  ;;  %v3686_v18 = vadd.f32 %v6029_v55, %v3583_v39  ;;  %v3586_v3 = vadd.f32 %v4508_v47, %v3321_v62  ;;  %v3322_v30 = vadd.f32 %v3267_v28, %v3060_v22 }
 0x1fd   : > { %v3519_v31 = vpop.f32.mrf.mxu0  ;;  %v4478_v16 = vpop.f32.mrf.mxu1  ;;  %v3067_v12 = vadd.f32 %v6392_v17, %v2802_v44  ;;  %v3065_v39 = vadd.f32 %v6019_v60, %v2800_v5 }
 0x1fe   : > { %3752 = vst [vmem:[%s6045_s9 + $0xb0] sm:$0xff] %v3720_v54  ;;  %v3718_v52 = vmax.f32 %v3686_v18, 0.0  ;;  %v3689_v6 = vadd.f32 %v6029_v55, %v3586_v3  ;;  %v3584_v45 = vadd.f32 %v3519_v31, %v3319_v9  ;;  %v3325_v51 = vadd.f32 %v4478_v16, %v3063_v49 }
 0x1ff   : > { %v4511_v46 = vpop.f32.mrf.mxu0  ;;  %v3270_v63 = vpop.f32.mrf.mxu1 }
 0x200   : > { %3750 = vst [vmem:[%s6045_s9 + $0xa0] sm:$0xff] %v3718_v52  ;;  %v3721_v19 = vmax.f32 %v3689_v6, 0.0  ;;  %v3687_v13 = vadd.f32 %v6029_v55, %v3584_v45  ;;  %v3589_v41 = vadd.f32 %v4511_v46, %v3324_v50  ;;  %v3323_v29 = vadd.f32 %v3270_v63, %v3061_v32 }
 0x201   : > { %v3532_v8 = vpop.f32.mrf.mxu0  ;;  %v4481_v25 = vpop.f32.mrf.mxu1 }
 0x202   : > { %3753 = vst [vmem:[%s6045_s9 + $0xb8] sm:$0xff] %v3721_v19  ;;  %v3719_v7 = vmax.f32 %v3687_v13, 0.0  ;;  %v3692_v53 = vadd.f32 %v6029_v55, %v3589_v41  ;;  %v3587_v4 = vadd.f32 %v3532_v8, %v3322_v30  ;;  %v3328_v36 = vadd.f32 %v4481_v25, %v3066_v20 }
 0x203   : > { %v4512_v62 = vpop.f32.mrf.mxu0  ;;  %v3283_v61 = vpop.f32.mrf.mxu1 }
 0x204   : > { %3751 = vst [vmem:[%s6045_s9 + $0xa8] sm:$0xff] %v3719_v7  ;;  %v3724_v26 = vmax.f32 %v3692_v53, 0.0  ;;  %v3690_v1 = vadd.f32 %v6029_v55, %v3587_v4  ;;  %v3590_v2 = vadd.f32 %v4512_v62, %v3325_v51  ;;  %v3326_v23 = vadd.f32 %v3283_v61, %v3064_v57 }
 0x205   : > { %v3535_v0 = vpop.f32.mrf.mxu0  ;;  %v4482_v43 = vpop.f32.mrf.mxu1 }
 0x206   : > { %3756 = vst [vmem:[%s6045_s9 + $0xd0] sm:$0xff] %v3724_v26  ;;  %v3722_v59 = vmax.f32 %v3690_v1, 0.0  ;;  %v3693_v11 = vadd.f32 %v6029_v55, %v3590_v2  ;;  %v3588_v9 = vadd.f32 %v3535_v0, %v3323_v29  ;;  %v3329_v21 = vadd.f32 %v4482_v43, %v3067_v12 }
 0x207   : > { %v4515_v58 = vpop.f32.mrf.mxu0  ;;  %v3286_v22 = vpop.f32.mrf.mxu1 }
 0x208   : > { %3754 = vst [vmem:[%s6045_s9 + $0xc0] sm:$0xff] %v3722_v59  ;;  %v3725_v38 = vmax.f32 %v3693_v11, 0.0  ;;  %v3691_v35 = vadd.f32 %v6029_v55, %v3588_v9  ;;  %v3593_v15 = vadd.f32 %v4515_v58, %v3328_v36  ;;  %v3327_v50 = vadd.f32 %v3286_v22, %v3065_v39 }
 0x209   : > { %v3548_v47 = vpop.f32.mrf.mxu0 }
 0x20a   : > { %3757 = vst [vmem:[%s6045_s9 + $0xd8] sm:$0xff] %v3725_v38  ;;  %v3723_v54 = vmax.f32 %v3691_v35, 0.0  ;;  %v3696_v18 = vadd.f32 %v6029_v55, %v3593_v15  ;;  %v3591_v3 = vadd.f32 %v3548_v47, %v3326_v23 }
 0x20b   : > { %v4516_v60 = vpop.f32.mrf.mxu0 }
 0x20c   : > { %3755 = vst [vmem:[%s6045_s9 + $0xc8] sm:$0xff] %v3723_v54  ;;  %v3728_v28 = vmax.f32 %v3696_v18, 0.0  ;;  %v3694_v40 = vadd.f32 %v6029_v55, %v3591_v3  ;;  %v3594_v14 = vadd.f32 %v4516_v60, %v3329_v21 }
 0x20d   : > { %v3551_v34 = vpop.f32.mrf.mxu0 }
 0x20e   : > { %3760 = vst [vmem:[%s6045_s9 + $0xf0] sm:$0xff] %v3728_v28  ;;  %v3726_v42 = vmax.f32 %v3694_v40, 0.0  ;;  %v3697_v49 = vadd.f32 %v6029_v55, %v3594_v14  ;;  %v3592_v31 = vadd.f32 %v3551_v34, %v3327_v50 }
 0x210   : > { %3758 = vst [vmem:[%s6045_s9 + $0xe0] sm:$0xff] %v3726_v42  ;;  %v3729_v52 = vmax.f32 %v3697_v49, 0.0  ;;  %v3695_v6 = vadd.f32 %v6029_v55, %v3592_v31 }
 0x212   : > { %3761 = vst [vmem:[%s6045_s9 + $0xf8] sm:$0xff] %v3729_v52  ;;  %v3727_v30 = vmax.f32 %v3695_v6, 0.0 }
 0x214   : > { %3759 = vst [vmem:[%s6045_s9 + $0xe8] sm:$0xff] %v3727_v30 }
 0x215   : > { %4633 = shalt.err (!%p4630_p5)
}
 0x216   : > { %s4634_s29 = scalar_lea.hbm %s6183_s21, 4096  ;;  %s4638_s5 = scalar_lea.hbm %s6239_s3, 8192 }
 0x217   : > { %p4635_p6 = scmp.ne.s32.totalorder %s6183_s21, %s4634_s29  ;;  %p4639_p10 = scmp.lt.s32.totalorder %s6183_s21, %s6239_s3 }
 0x218   : > { %p4640_p11 = scmp.lt.s32.totalorder %s4638_s5, %s4634_s29 }
 0x219   : > { %p4636_p7 = pnand %p4635_p6, %p4763_p4 }
 0x21a   : > { %p4641_p12 = por %p4640_p11, %p4639_p10 }
 0x21b   : > { %p4637_p9 = pneg %p4636_p7 }
 0x21d   : > { %p4642_p13 = pnand %p4641_p12, %p4637_p9 }
 0x21f   : > { %4645 = shalt.err (!%p4642_p13)
}
 0x220   : > { %s4701_s8 = smov 128   ;;  %s4702_s9 = smov 8  }
 0x221   : > { %4529 = dma.vmem_to_hbm [thread:$0]  (%p4763_p4), %s6185_s11, 4096, %s6183_s21, %s6191_s15, %s4701_s8, %s4701_s8, %s4702_s9  }
 0x222 PF: > { %p4535_p0 = scmp.ge.s32.totalorder %s4696_s17, 2  ;;  %s3792_s10 = sand.u32 1, %s4676_s12  }
 0x223   : > { %s3793_s18 = scalar_lea.sflag [#allocation3], %s3792_s10 }
 0x224   : > { %p4532_p1 = pnand %p4535_p0, %p4770_p8 }
 0x226   : > { %p4533_p2 = pneg %p4532_p1 }
 0x228   : > { %4671 = dma.done.wait (%p4533_p2), %s3793_s18, 4096  }
 0x229   : > { %4673 = vsyncadd (%p4533_p2), %s3793_s18, 4294963200  ;;  %s16_s17 = sadd.s32 1, %s4696_s17   ;;  %s6393_s12 = smov %s4680_s13 }
 0x22a   : > { %p13_p3 = scmp.ge.s32.totalorder %s16_s17, 4   ;;  %s6394_s13 = smov %s4684_s14 }
 0x22b   : > { %s6395_s14 = smov %s4776_s25  ;;  %s6396_s15 = smov %s4692_s16 }
 0x22c   : > { %s6397_s16 = smov %s6399_s20  ;;  %15 = sbr.rel (!%p13_p3) target bundleno = 4 (0x4), region = 81 }
 0x231   :  { %3798 = vsyncpa [#allocation3], 1 }
 0x232   :  { %3800 = vsyncpa [#allocation3 + $0x1], 1 }

</bundles_post_ra>
